<compile_context>
chip_gen: v5e
topology: v5e:2x2
jax: 0.10.0
libtpu: 0.0.40
codegen_flags: <defaults>
</compile_context>

<pallas_src>
import jax
import jax.numpy as jnp
from jax.experimental import pallas as pl
from jax.experimental.pallas import tpu as pltpu

# ------------------------- model hyper-parameters ---------------------------
BATCH = 2
CHANNELS = 3
IMG = 32
PATCH = 16
HIDDEN = 32
NUM_HEADS = 4
HEAD_DIM = HIDDEN // NUM_HEADS
MLP_DIM = 64
NUM_LAYERS = 2
HEAD_HIDDEN = 64          # scaled stand-in for the 256-wide head layer
NUM_CLASSES = 5
LN_EPS = 1e-6

N_PATCHES = (IMG // PATCH) * (IMG // PATCH)     # 4
SEQ = N_PATCHES + 1                             # CLS + patches = 5
PATCH_DIM = CHANNELS * PATCH * PATCH            # 768 (already lane-dense)
PAD = 128                                       # lane-dense feature width
ROWS = BATCH * SEQ                              # 10 stacked token rows
RPAD = ((ROWS + 7) // 8) * 8                    # 16 (sublane-aligned)
SPAD = NUM_HEADS * RPAD                         # 64 head-stacked key rows
NEG = -1e30                                     # additive attention mask value


# ------------------------------ fused kernel --------------------------------
def _vit_kernel(x_ref, bias_ref, selq_ref, selv_ref, hidm_ref, notv_ref,
                patch_w_ref, pos_ref,
                ln1_g_ref, ln1_b_ref, qkv_w_ref, qkv_b_ref,
                proj_w_ref, proj_b_ref, ln2_g_ref, ln2_b_ref,
                mlp_w1_ref, mlp_b1_ref, mlp_w2_ref, mlp_b2_ref,
                lnf_g_ref, lnf_b_ref, hw1_ref, hb1_ref, hw2_ref, hb2_ref,
                out_ref):
    f32, bf16 = jnp.float32, jnp.bfloat16

    # Host-built constants (loaded once, reused across the unrolled layer loop).
    attn_bias = bias_ref[...]            # (RPAD, SPAD)  block-diag 0 / -1e30
    head_sel_q = selq_ref[...]           # (SPAD, PAD)   block h keeps Q lanes of head h
    head_sel_v = selv_ref[...]           # (SPAD, PAD)   block h keeps V lanes of head h
    head_sel_v16 = head_sel_v.astype(bf16)
    hid_mask = hidm_ref[...]             # (1, PAD)      1.0 on the real HIDDEN lanes
    not_v = notv_ref[...]                # (1, PAD)      1.0 outside the V lane group
    scale = 1.0 / (HEAD_DIM ** 0.5)

    def layernorm(v, g, b):
        # Real features live in lanes [0, HIDDEN); padded lanes of v are exactly 0.
        mu = jnp.sum(v, axis=-1, keepdims=True) * (1.0 / HIDDEN)
        d = (v - mu) * hid_mask                                # centered, pad lanes -> 0
        var = jnp.sum(d * d, axis=-1, keepdims=True) * (1.0 / HIDDEN)
        return d * jax.lax.rsqrt(var + LN_EPS) * g + b

    # ---- patch embedding; CLS token + positional + patch bias folded into pos ----
    tok = jnp.dot(x_ref[...].astype(bf16), patch_w_ref[...],
                  preferred_element_type=f32) + pos_ref[...]   # (RPAD, PAD)

    for l in range(NUM_LAYERS):
        # ---------------- self-attention block (pre-LN, all heads fused) ----------
        h1 = layernorm(tok, ln1_g_ref[l], ln1_b_ref[l])
        # qkv packed along lanes as [Q | V | K | 0]
        qkv = jnp.dot(h1.astype(bf16), qkv_w_ref[l],
                      preferred_element_type=f32) + qkv_b_ref[l]          # (RPAD, PAD)

        # Head-stacked key/value rows (SPAD, PAD): block h = rows of head h.
        qkv_stk = jnp.concatenate([qkv] * NUM_HEADS, axis=0)
        # Roll K lanes [2H, 3H) down onto [0, H) so head-h K aligns with head-h Q lanes.
        k_stk = pltpu.roll(qkv_stk, shift=2 * HIDDEN, axis=1) * head_sel_q
        v_stk = qkv_stk * head_sel_v

        # All heads' scores in one MXU pass: column block h holds head-h scores.
        s = jnp.einsum("qc,kc->qk", qkv.astype(bf16), k_stk.astype(bf16),
                       preferred_element_type=f32) * scale + attn_bias    # (RPAD, SPAD)
        # Shared row-max is a valid softmax stabiliser (denominators are per head).
        p = jnp.exp(s - jnp.max(s, axis=-1, keepdims=True))
        p16 = p.astype(bf16)
        # Per-(row, head) softmax denominators broadcast onto head-h output lanes.
        den = jnp.dot(p16, head_sel_v16, preferred_element_type=f32) + not_v
        o = jnp.dot(p16, v_stk.astype(bf16), preferred_element_type=f32)
        attn = o * pl.reciprocal(den, approx=True)             # normalised, V lane group
        # proj_w rows live at the V lane group [HIDDEN, 2*HIDDEN).
        tok = tok + jnp.dot(attn.astype(bf16), proj_w_ref[l],
                            preferred_element_type=f32) + proj_b_ref[l]

        # ------------------------------- MLP block --------------------------------
        h2 = layernorm(tok, ln2_g_ref[l], ln2_b_ref[l])
        m = jnp.dot(h2.astype(bf16), mlp_w1_ref[l],
                    preferred_element_type=f32) + mlp_b1_ref[l]
        m = jax.nn.gelu(m, approximate=True)   # TODO(synk): torch default is exact erf
        tok = tok + jnp.dot(m.astype(bf16), mlp_w2_ref[l],
                            preferred_element_type=f32) + mlp_b2_ref[l]

    # ---- final LN + classification head + sigmoid (all rows; CLS sliced outside) ----
    tok = layernorm(tok, lnf_g_ref[...], lnf_b_ref[...])
    h = jnp.dot(tok.astype(bf16), hw1_ref[...],
                preferred_element_type=f32) + hb1_ref[...]
    h = jnp.maximum(h, 0.0)                    # ReLU (Dropout == identity)
    y = jnp.dot(h.astype(bf16), hw2_ref[...],
                preferred_element_type=f32) + hb2_ref[...]
    out_ref[...] = jax.nn.sigmoid(y)           # torch.sigmoid(self.vit(x))


# ----------------------------- parameter init --------------------------------
def _pad_to(a, shape, dtype=jnp.float32):
    out = jnp.zeros(shape, jnp.float32)
    out = out.at[tuple(slice(0, s) for s in a.shape)].set(a.astype(jnp.float32))
    return out.astype(dtype)


def init_params(key):
    def nrm(k, shape, scale=0.02):
        return (scale * jax.random.normal(k, shape)).astype(jnp.float32)

    keys = jax.random.split(key, 8 + NUM_LAYERS)

    patch_w = nrm(keys[0], (PATCH_DIM, HIDDEN))
    patch_b = nrm(keys[1], (HIDDEN,))
    cls = nrm(keys[2], (1, HIDDEN))
    pos = nrm(keys[3], (SEQ, HIDDEN))
    head_w1 = nrm(keys[4], (HIDDEN, HEAD_HIDDEN))
    head_b1 = nrm(keys[5], (HEAD_HIDDEN,))
    head_w2 = nrm(keys[6], (HEAD_HIDDEN, NUM_CLASSES))
    head_b2 = nrm(keys[7], (NUM_CLASSES,))

    # CLS-slot rows of the stacked input are all-zero, so their patch embedding is 0;
    # fold (CLS token + pos[0]) and (patch_b + pos[1:]) into one per-row constant,
    # tiled across the batch; padding rows stay 0.
    per_sample = jnp.concatenate([cls + pos[0:1], pos[1:] + patch_b[None, :]], axis=0)
    pos_all = jnp.tile(per_sample, (BATCH, 1))                  # (ROWS, HIDDEN)

    ones_h = _pad_to(jnp.ones((1, HIDDEN), jnp.float32), (1, PAD))
    zeros_p = jnp.zeros((1, PAD), jnp.float32)

    names = ("ln1_g", "ln1_b", "qkv_w", "qkv_b", "proj_w", "proj_b",
             "ln2_g", "ln2_b", "mlp_w1", "mlp_b1", "mlp_w2", "mlp_b2")
    layers = {n: [] for n in names}
    for l in range(NUM_LAYERS):
        lk = jax.random.split(keys[8 + l], 8)
        qkv_real = nrm(lk[0], (HIDDEN, 3 * HIDDEN))             # [Wq | Wk | Wv]
        qkv_bias = nrm(lk[1], (3 * HIDDEN,))
        wq = qkv_real[:, 0:HIDDEN]
        wk = qkv_real[:, HIDDEN:2 * HIDDEN]
        wv = qkv_real[:, 2 * HIDDEN:3 * HIDDEN]
        bq = qkv_bias[0:HIDDEN]
        bk = qkv_bias[HIDDEN:2 * HIDDEN]
        bv = qkv_bias[2 * HIDDEN:3 * HIDDEN]
        # Lane packing [Q | V | K | 0] (kernel rolls K down onto the Q lanes).
        qkv_p = jnp.zeros((PAD, PAD), jnp.float32)
        qkv_p = qkv_p.at[:HIDDEN, 0:HIDDEN].set(wq)
        qkv_p = qkv_p.at[:HIDDEN, HIDDEN:2 * HIDDEN].set(wv)
        qkv_p = qkv_p.at[:HIDDEN, 2 * HIDDEN:3 * HIDDEN].set(wk)
        qkv_bp = jnp.zeros((1, PAD), jnp.float32)
        qkv_bp = qkv_bp.at[0, 0:HIDDEN].set(bq)
        qkv_bp = qkv_bp.at[0, HIDDEN:2 * HIDDEN].set(bv)
        qkv_bp = qkv_bp.at[0, 2 * HIDDEN:3 * HIDDEN].set(bk)
        # Attention output lands on the V lane group [32, 64) -> proj rows there.
        proj_real = nrm(lk[2], (HIDDEN, HIDDEN))
        proj_bias = nrm(lk[3], (HIDDEN,))
        proj_p = jnp.zeros((PAD, PAD), jnp.float32)
        proj_p = proj_p.at[HIDDEN:2 * HIDDEN, 0:HIDDEN].set(proj_real)

        layers["ln1_g"].append(ones_h)
        layers["ln1_b"].append(zeros_p)
        layers["qkv_w"].append(qkv_p.astype(jnp.bfloat16))
        layers["qkv_b"].append(qkv_bp)
        layers["proj_w"].append(proj_p.astype(jnp.bfloat16))
        layers["proj_b"].append(_pad_to(proj_bias[None, :], (1, PAD)))
        layers["ln2_g"].append(ones_h)
        layers["ln2_b"].append(zeros_p)
        layers["mlp_w1"].append(_pad_to(nrm(lk[4], (HIDDEN, MLP_DIM)),
                                        (PAD, PAD), jnp.bfloat16))
        layers["mlp_b1"].append(_pad_to(nrm(lk[6], (1, MLP_DIM)), (1, PAD)))
        layers["mlp_w2"].append(_pad_to(nrm(lk[5], (MLP_DIM, HIDDEN)),
                                        (PAD, PAD), jnp.bfloat16))
        layers["mlp_b2"].append(_pad_to(nrm(lk[7], (1, HIDDEN)), (1, PAD)))

    params = {
        "patch_w": _pad_to(patch_w, (PATCH_DIM, PAD), jnp.bfloat16),
        "pos_all": _pad_to(pos_all, (RPAD, PAD)),
        "lnf_g": ones_h, "lnf_b": zeros_p,
        "hw1": _pad_to(head_w1, (PAD, PAD), jnp.bfloat16),
        "hb1": _pad_to(head_b1[None, :], (1, PAD)),
        "hw2": _pad_to(head_w2, (PAD, PAD), jnp.bfloat16),
        "hb2": _pad_to(head_b2[None, :], (1, PAD)),
    }
    for n in names:
        params[n] = jnp.stack(layers[n], axis=0)
    return params


# -------------------------- host-built kernel constants ----------------------
def _kernel_constants():
    # Block-diagonal attention bias over the stacked rows: query row q may only
    # attend to key row k of the same sample; padding rows never match.
    rows = jnp.arange(RPAD)
    samp_q = jnp.where(rows < ROWS, rows // SEQ, -1)
    kpos = jnp.arange(SPAD) % RPAD
    samp_k = jnp.where(kpos < ROWS, kpos // SEQ, -2)
    attn_bias = jnp.where(samp_q[:, None] == samp_k[None, :], 0.0, NEG)
    attn_bias = attn_bias.astype(jnp.float32)                     # (RPAD, SPAD)

    srow = jnp.arange(SPAD)[:, None]
    lane = jnp.arange(PAD)[None, :]
    blk = srow // RPAD                                             # head id of stacked row
    head_sel_q = ((lane >= blk * HEAD_DIM) &
                  (lane < (blk + 1) * HEAD_DIM)).astype(jnp.float32)          # (SPAD, PAD)
    head_sel_v = ((lane >= HIDDEN + blk * HEAD_DIM) &
                  (lane < HIDDEN + (blk + 1) * HEAD_DIM)).astype(jnp.float32)  # (SPAD, PAD)

    lane1 = jnp.arange(PAD)[None, :]
    hid_mask = (lane1 < HIDDEN).astype(jnp.float32)                           # (1, PAD)
    not_v = ((lane1 < HIDDEN) | (lane1 >= 2 * HIDDEN)).astype(jnp.float32)    # (1, PAD)
    return attn_bias, head_sel_q, head_sel_v, hid_mask, not_v


# ------------------------------- forward pass --------------------------------
def forward(params, x):
    """x: (B, C, H, W) float32 -> (B, NUM_CLASSES) sigmoid probabilities."""
    B, C, H, W = x.shape
    assert B == BATCH and C == CHANNELS and H == IMG and W == IMG
    P = PATCH
    # patchify (layout glue only): NCHW -> (B, n_patches, C*P*P)
    xp = x.reshape(B, C, H // P, P, W // P, P)
    xp = xp.transpose(0, 2, 4, 1, 3, 5).reshape(B, N_PATCHES, PATCH_DIM)
    # prepend an all-zero row per image: the CLS slot (its embedding is in pos_all)
    xp = jnp.concatenate([jnp.zeros((B, 1, PATCH_DIM), x.dtype), xp], axis=1)
    # stack the batch along sublanes and pad to a multiple of 8 rows
    x_stk = xp.reshape(B * SEQ, PATCH_DIM)
    x_stk = jnp.pad(x_stk, ((0, RPAD - B * SEQ), (0, 0)))

    attn_bias, head_sel_q, head_sel_v, hid_mask, not_v = _kernel_constants()

    def full(shape):
        return pl.BlockSpec(shape, lambda i, _n=len(shape): (0,) * _n)

    lw = (NUM_LAYERS, PAD, PAD)      # stacked per-layer weight (bf16)
    lb = (NUM_LAYERS, 1, PAD)        # stacked per-layer bias / LN param (f32)
    in_specs = [
        full((RPAD, PATCH_DIM)),     # x_stk
        full((RPAD, SPAD)),          # attn_bias
        full((SPAD, PAD)),           # head_sel_q
        full((SPAD, PAD)),           # head_sel_v
        full((1, PAD)),              # hid_mask
        full((1, PAD)),              # not_v
        full((PATCH_DIM, PAD)),      # patch_w
        full((RPAD, PAD)),           # pos_all
        full(lb), full(lb), full(lw), full(lb), full(lw), full(lb),
        full(lb), full(lb), full(lw), full(lb), full(lw), full(lb),
        full((1, PAD)), full((1, PAD)),
        full((PAD, PAD)), full((1, PAD)), full((PAD, PAD)), full((1, PAD)),
    ]

    out = pl.pallas_call(
        _vit_kernel,
        grid=(1,),   # whole sublane-stacked batch in one step; for larger B,
                     # tile the stacked rows along a "parallel" grid axis instead.
        in_specs=in_specs,
        out_specs=pl.BlockSpec((RPAD, PAD), lambda i: (0, 0)),
        out_shape=jax.ShapeDtypeStruct((RPAD, PAD), jnp.float32),
        compiler_params=pltpu.CompilerParams(dimension_semantics=("arbitrary",)),
    )(x_stk, attn_bias, head_sel_q, head_sel_v, hid_mask, not_v,
      params["patch_w"], params["pos_all"],
      params["ln1_g"], params["ln1_b"], params["qkv_w"], params["qkv_b"],
      params["proj_w"], params["proj_b"], params["ln2_g"], params["ln2_b"],
      params["mlp_w1"], params["mlp_b1"], params["mlp_w2"], params["mlp_b2"],
      params["lnf_g"], params["lnf_b"],
      params["hw1"], params["hb1"], params["hw2"], params["hb2"])

    # CLS rows sit at stride SEQ in the stacked output; keep real classes only.
    return out[0::SEQ][:B, :NUM_CLASSES]


# ----------------------------------- main -------------------------------------
if __name__ == "__main__":
    key = jax.random.PRNGKey(0)
    pkey, xkey = jax.random.split(key)
    params = init_params(pkey)
    x = jax.random.normal(xkey, (BATCH, CHANNELS, IMG, IMG), dtype=jnp.float32)

    out = jax.jit(forward)(params, x)
    out = jax.block_until_ready(out)

    assert out.shape == (BATCH, NUM_CLASSES)
    assert bool(jnp.all(jnp.isfinite(out)))
    assert bool(jnp.all((out >= 0.0) & (out <= 1.0)))
    print("KERNEL_OK")
</pallas_src>

<mosaic_0001>
module attributes {stable_mosaic.version = 11 : i64} {
  func.func @_vit_kernel(%arg0: i32, %arg1: memref<16x768xf32, #tpu.memory_space<vmem>>, %arg2: memref<16x64xf32, #tpu.memory_space<vmem>>, %arg3: memref<64x128xf32, #tpu.memory_space<vmem>>, %arg4: memref<64x128xf32, #tpu.memory_space<vmem>>, %arg5: memref<1x128xf32, #tpu.memory_space<vmem>>, %arg6: memref<1x128xf32, #tpu.memory_space<vmem>>, %arg7: memref<768x128xbf16, #tpu.memory_space<vmem>>, %arg8: memref<16x128xf32, #tpu.memory_space<vmem>>, %arg9: memref<2x1x128xf32, #tpu.memory_space<vmem>>, %arg10: memref<2x1x128xf32, #tpu.memory_space<vmem>>, %arg11: memref<2x128x128xbf16, #tpu.memory_space<vmem>>, %arg12: memref<2x1x128xf32, #tpu.memory_space<vmem>>, %arg13: memref<2x128x128xbf16, #tpu.memory_space<vmem>>, %arg14: memref<2x1x128xf32, #tpu.memory_space<vmem>>, %arg15: memref<2x1x128xf32, #tpu.memory_space<vmem>>, %arg16: memref<2x1x128xf32, #tpu.memory_space<vmem>>, %arg17: memref<2x128x128xbf16, #tpu.memory_space<vmem>>, %arg18: memref<2x1x128xf32, #tpu.memory_space<vmem>>, %arg19: memref<2x128x128xbf16, #tpu.memory_space<vmem>>, %arg20: memref<2x1x128xf32, #tpu.memory_space<vmem>>, %arg21: memref<1x128xf32, #tpu.memory_space<vmem>>, %arg22: memref<1x128xf32, #tpu.memory_space<vmem>>, %arg23: memref<128x128xbf16, #tpu.memory_space<vmem>>, %arg24: memref<1x128xf32, #tpu.memory_space<vmem>>, %arg25: memref<128x128xbf16, #tpu.memory_space<vmem>>, %arg26: memref<1x128xf32, #tpu.memory_space<vmem>>, %arg27: memref<16x128xf32, #tpu.memory_space<vmem>>) attributes {dimension_semantics = [#tpu.dimension_semantics<arbitrary>], iteration_bounds = array<i64: 1>, scalar_prefetch = 0 : i64, scratch_operands = 0 : i64, tpu.core_type = #tpu.core_type<tc>, window_params = [{pipeline_mode = #tpu.pipeline_mode<synchronous>, transform_indices = @transform_0, window_bounds = array<i64: 16, 768>}, {pipeline_mode = #tpu.pipeline_mode<synchronous>, transform_indices = @transform_1, window_bounds = array<i64: 16, 64>}, {pipeline_mode = #tpu.pipeline_mode<synchronous>, transform_indices = @transform_2, window_bounds = array<i64: 64, 128>}, {pipeline_mode = #tpu.pipeline_mode<synchronous>, transform_indices = @transform_3, window_bounds = array<i64: 64, 128>}, {pipeline_mode = #tpu.pipeline_mode<synchronous>, transform_indices = @transform_4, window_bounds = array<i64: 1, 128>}, {pipeline_mode = #tpu.pipeline_mode<synchronous>, transform_indices = @transform_5, window_bounds = array<i64: 1, 128>}, {pipeline_mode = #tpu.pipeline_mode<synchronous>, transform_indices = @transform_6, window_bounds = array<i64: 768, 128>}, {pipeline_mode = #tpu.pipeline_mode<synchronous>, transform_indices = @transform_7, window_bounds = array<i64: 16, 128>}, {pipeline_mode = #tpu.pipeline_mode<synchronous>, transform_indices = @transform_8, window_bounds = array<i64: 2, 1, 128>}, {pipeline_mode = #tpu.pipeline_mode<synchronous>, transform_indices = @transform_9, window_bounds = array<i64: 2, 1, 128>}, {pipeline_mode = #tpu.pipeline_mode<synchronous>, transform_indices = @transform_10, window_bounds = array<i64: 2, 128, 128>}, {pipeline_mode = #tpu.pipeline_mode<synchronous>, transform_indices = @transform_11, window_bounds = array<i64: 2, 1, 128>}, {pipeline_mode = #tpu.pipeline_mode<synchronous>, transform_indices = @transform_12, window_bounds = array<i64: 2, 128, 128>}, {pipeline_mode = #tpu.pipeline_mode<synchronous>, transform_indices = @transform_13, window_bounds = array<i64: 2, 1, 128>}, {pipeline_mode = #tpu.pipeline_mode<synchronous>, transform_indices = @transform_14, window_bounds = array<i64: 2, 1, 128>}, {pipeline_mode = #tpu.pipeline_mode<synchronous>, transform_indices = @transform_15, window_bounds = array<i64: 2, 1, 128>}, {pipeline_mode = #tpu.pipeline_mode<synchronous>, transform_indices = @transform_16, window_bounds = array<i64: 2, 128, 128>}, {pipeline_mode = #tpu.pipeline_mode<synchronous>, transform_indices = @transform_17, window_bounds = array<i64: 2, 1, 128>}, {pipeline_mode = #tpu.pipeline_mode<synchronous>, transform_indices = @transform_18, window_bounds = array<i64: 2, 128, 128>}, {pipeline_mode = #tpu.pipeline_mode<synchronous>, transform_indices = @transform_19, window_bounds = array<i64: 2, 1, 128>}, {pipeline_mode = #tpu.pipeline_mode<synchronous>, transform_indices = @transform_20, window_bounds = array<i64: 1, 128>}, {pipeline_mode = #tpu.pipeline_mode<synchronous>, transform_indices = @transform_21, window_bounds = array<i64: 1, 128>}, {pipeline_mode = #tpu.pipeline_mode<synchronous>, transform_indices = @transform_22, window_bounds = array<i64: 128, 128>}, {pipeline_mode = #tpu.pipeline_mode<synchronous>, transform_indices = @transform_23, window_bounds = array<i64: 1, 128>}, {pipeline_mode = #tpu.pipeline_mode<synchronous>, transform_indices = @transform_24, window_bounds = array<i64: 128, 128>}, {pipeline_mode = #tpu.pipeline_mode<synchronous>, transform_indices = @transform_25, window_bounds = array<i64: 1, 128>}, {pipeline_mode = #tpu.pipeline_mode<synchronous>, transform_indices = @transform_26, window_bounds = array<i64: 16, 128>}]} {
    %c0 = arith.constant 0 : index
    %c0_0 = arith.constant 0 : index
    %0 = vector.load %arg2[%c0, %c0_0] : memref<16x64xf32, #tpu.memory_space<vmem>>, vector<16x64xf32>
    %c0_1 = arith.constant 0 : index
    %c0_2 = arith.constant 0 : index
    %1 = vector.load %arg3[%c0_1, %c0_2] : memref<64x128xf32, #tpu.memory_space<vmem>>, vector<64x128xf32>
    %c0_3 = arith.constant 0 : index
    %c0_4 = arith.constant 0 : index
    %2 = vector.load %arg4[%c0_3, %c0_4] : memref<64x128xf32, #tpu.memory_space<vmem>>, vector<64x128xf32>
    %3 = arith.truncf %2 : vector<64x128xf32> to vector<64x128xbf16>
    %c0_5 = arith.constant 0 : index
    %c0_6 = arith.constant 0 : index
    %4 = vector.load %arg5[%c0_5, %c0_6] : memref<1x128xf32, #tpu.memory_space<vmem>>, vector<1x128xf32>
    %c0_7 = arith.constant 0 : index
    %c0_8 = arith.constant 0 : index
    %5 = vector.load %arg6[%c0_7, %c0_8] : memref<1x128xf32, #tpu.memory_space<vmem>>, vector<1x128xf32>
    %c0_9 = arith.constant 0 : index
    %c0_10 = arith.constant 0 : index
    %6 = vector.load %arg1[%c0_9, %c0_10] : memref<16x768xf32, #tpu.memory_space<vmem>>, vector<16x768xf32>
    %7 = arith.truncf %6 : vector<16x768xf32> to vector<16x768xbf16>
    %c0_11 = arith.constant 0 : index
    %c0_12 = arith.constant 0 : index
    %8 = vector.load %arg7[%c0_11, %c0_12] : memref<768x128xbf16, #tpu.memory_space<vmem>>, vector<768x128xbf16>
    %cst = arith.constant dense<0.000000e+00> : vector<16x128xf32>
    %9 = tpu.matmul %7, %8, %cst {dimension_numbers = #tpu.dot_dimension_numbers<[1], [0], [0], [1], [0, 0, 1, 1], [], []>} : vector<16x768xbf16>, vector<768x128xbf16>, vector<16x128xf32> -> vector<16x128xf32>
    %c0_13 = arith.constant 0 : index
    %c0_14 = arith.constant 0 : index
    %10 = vector.load %arg8[%c0_13, %c0_14] : memref<16x128xf32, #tpu.memory_space<vmem>>, vector<16x128xf32>
    %11 = arith.addf %9, %10 : vector<16x128xf32>
    %c0_15 = arith.constant 0 : index
    %c0_16 = arith.constant 0 : index
    %c0_17 = arith.constant 0 : index
    %12 = vector.load %arg9[%c0_15, %c0_16, %c0_17] : memref<2x1x128xf32, #tpu.memory_space<vmem>>, vector<1x1x128xf32>
    %13 = vector.shape_cast %12 : vector<1x1x128xf32> to vector<1x128xf32>
    %c0_18 = arith.constant 0 : index
    %c0_19 = arith.constant 0 : index
    %c0_20 = arith.constant 0 : index
    %14 = vector.load %arg10[%c0_18, %c0_19, %c0_20] : memref<2x1x128xf32, #tpu.memory_space<vmem>>, vector<1x1x128xf32>
    %15 = vector.shape_cast %14 : vector<1x1x128xf32> to vector<1x128xf32>
    %cst_21 = arith.constant dense<0.000000e+00> : vector<16xf32>
    %16 = vector.multi_reduction <add>, %11, %cst_21 [1] : vector<16x128xf32> to vector<16xf32>
    %17 = vector.shape_cast %16 : vector<16xf32> to vector<16x1xf32>
    %cst_22 = arith.constant 3.125000e-02 : f32
    %18 = vector.broadcast %cst_22 : f32 to vector<16x1xf32>
    %19 = arith.mulf %17, %18 : vector<16x1xf32>
    %20 = vector.broadcast %19 : vector<16x1xf32> to vector<16x128xf32>
    %21 = arith.subf %11, %20 : vector<16x128xf32>
    %22 = vector.broadcast %4 : vector<1x128xf32> to vector<16x128xf32>
    %23 = arith.mulf %21, %22 : vector<16x128xf32>
    %24 = arith.mulf %23, %23 : vector<16x128xf32>
    %cst_23 = arith.constant dense<0.000000e+00> : vector<16xf32>
    %25 = vector.multi_reduction <add>, %24, %cst_23 [1] : vector<16x128xf32> to vector<16xf32>
    %26 = vector.shape_cast %25 : vector<16xf32> to vector<16x1xf32>
    %cst_24 = arith.constant 3.125000e-02 : f32
    %27 = vector.broadcast %cst_24 : f32 to vector<16x1xf32>
    %28 = arith.mulf %26, %27 : vector<16x1xf32>
    %cst_25 = arith.constant 9.99999997E-7 : f32
    %29 = vector.broadcast %cst_25 : f32 to vector<16x1xf32>
    %30 = arith.addf %28, %29 : vector<16x1xf32>
    %31 = math.rsqrt %30 : vector<16x1xf32>
    %32 = vector.broadcast %31 : vector<16x1xf32> to vector<16x128xf32>
    %33 = arith.mulf %23, %32 : vector<16x128xf32>
    %34 = vector.broadcast %13 : vector<1x128xf32> to vector<16x128xf32>
    %35 = arith.mulf %33, %34 : vector<16x128xf32>
    %36 = vector.broadcast %15 : vector<1x128xf32> to vector<16x128xf32>
    %37 = arith.addf %35, %36 : vector<16x128xf32>
    %38 = arith.truncf %37 : vector<16x128xf32> to vector<16x128xbf16>
    %c0_26 = arith.constant 0 : index
    %c0_27 = arith.constant 0 : index
    %c0_28 = arith.constant 0 : index
    %39 = vector.load %arg11[%c0_26, %c0_27, %c0_28] : memref<2x128x128xbf16, #tpu.memory_space<vmem>>, vector<1x128x128xbf16>
    %40 = vector.shape_cast %39 : vector<1x128x128xbf16> to vector<128x128xbf16>
    %cst_29 = arith.constant dense<0.000000e+00> : vector<16x128xf32>
    %41 = tpu.matmul %38, %40, %cst_29 {dimension_numbers = #tpu.dot_dimension_numbers<[1], [0], [0], [1], [0, 0, 1, 1], [], []>} : vector<16x128xbf16>, vector<128x128xbf16>, vector<16x128xf32> -> vector<16x128xf32>
    %c0_30 = arith.constant 0 : index
    %c0_31 = arith.constant 0 : index
    %c0_32 = arith.constant 0 : index
    %42 = vector.load %arg12[%c0_30, %c0_31, %c0_32] : memref<2x1x128xf32, #tpu.memory_space<vmem>>, vector<1x1x128xf32>
    %43 = vector.shape_cast %42 : vector<1x1x128xf32> to vector<1x128xf32>
    %44 = vector.broadcast %43 : vector<1x128xf32> to vector<16x128xf32>
    %45 = arith.addf %41, %44 : vector<16x128xf32>
    %46 = tpu.concatenate %45, %45, %45, %45 in 0 : vector<16x128xf32>, vector<16x128xf32>, vector<16x128xf32>, vector<16x128xf32> -> vector<64x128xf32>
    %c64_i32 = arith.constant 64 : i32
    %47 = tpu.dynamic_rotate %46 by %c64_i32 dim 1 : vector<64x128xf32>, i32 -> vector<64x128xf32>
    %48 = arith.mulf %47, %1 : vector<64x128xf32>
    %49 = arith.mulf %46, %2 : vector<64x128xf32>
    %50 = arith.truncf %45 : vector<16x128xf32> to vector<16x128xbf16>
    %51 = arith.truncf %48 : vector<64x128xf32> to vector<64x128xbf16>
    "tpu.trace_start"() <{level = 10 : i32, message = "qc,kc->qk"}> : () -> ()
    %cst_33 = arith.constant dense<0.000000e+00> : vector<16x64xf32>
    %52 = tpu.matmul %50, %51, %cst_33 {dimension_numbers = #tpu.dot_dimension_numbers<[1], [1], [0], [0], [0, 0, 1, 0], [], []>} : vector<16x128xbf16>, vector<64x128xbf16>, vector<16x64xf32> -> vector<16x64xf32>
    "tpu.trace_stop"() : () -> ()
    %cst_34 = arith.constant 0.353553385 : f32
    %53 = vector.broadcast %cst_34 : f32 to vector<16x64xf32>
    %54 = arith.mulf %52, %53 : vector<16x64xf32>
    %55 = arith.addf %54, %0 : vector<16x64xf32>
    %cst_35 = arith.constant dense<0xFF800000> : vector<16xf32>
    %56 = vector.multi_reduction <maximumf>, %55, %cst_35 [1] : vector<16x64xf32> to vector<16xf32>
    %57 = vector.shape_cast %56 : vector<16xf32> to vector<16x1xf32>
    %58 = vector.broadcast %57 : vector<16x1xf32> to vector<16x64xf32>
    %59 = arith.subf %55, %58 : vector<16x64xf32>
    %60 = math.exp %59 : vector<16x64xf32>
    %61 = arith.truncf %60 : vector<16x64xf32> to vector<16x64xbf16>
    %cst_36 = arith.constant dense<0.000000e+00> : vector<16x128xf32>
    %62 = tpu.matmul %61, %3, %cst_36 {dimension_numbers = #tpu.dot_dimension_numbers<[1], [0], [0], [1], [0, 0, 1, 1], [], []>} : vector<16x64xbf16>, vector<64x128xbf16>, vector<16x128xf32> -> vector<16x128xf32>
    %63 = vector.broadcast %5 : vector<1x128xf32> to vector<16x128xf32>
    %64 = arith.addf %62, %63 : vector<16x128xf32>
    %65 = arith.truncf %49 : vector<64x128xf32> to vector<64x128xbf16>
    %cst_37 = arith.constant dense<0.000000e+00> : vector<16x128xf32>
    %66 = tpu.matmul %61, %65, %cst_37 {dimension_numbers = #tpu.dot_dimension_numbers<[1], [0], [0], [1], [0, 0, 1, 1], [], []>} : vector<16x64xbf16>, vector<64x128xbf16>, vector<16x128xf32> -> vector<16x128xf32>
    %67 = tpu.reciprocal %64 {approx = true} : vector<16x128xf32> -> vector<16x128xf32>
    %68 = arith.mulf %66, %67 : vector<16x128xf32>
    %69 = arith.truncf %68 : vector<16x128xf32> to vector<16x128xbf16>
    %c0_38 = arith.constant 0 : index
    %c0_39 = arith.constant 0 : index
    %c0_40 = arith.constant 0 : index
    %70 = vector.load %arg13[%c0_38, %c0_39, %c0_40] : memref<2x128x128xbf16, #tpu.memory_space<vmem>>, vector<1x128x128xbf16>
    %71 = vector.shape_cast %70 : vector<1x128x128xbf16> to vector<128x128xbf16>
    %cst_41 = arith.constant dense<0.000000e+00> : vector<16x128xf32>
    %72 = tpu.matmul %69, %71, %cst_41 {dimension_numbers = #tpu.dot_dimension_numbers<[1], [0], [0], [1], [0, 0, 1, 1], [], []>} : vector<16x128xbf16>, vector<128x128xbf16>, vector<16x128xf32> -> vector<16x128xf32>
    %73 = arith.addf %11, %72 : vector<16x128xf32>
    %c0_42 = arith.constant 0 : index
    %c0_43 = arith.constant 0 : index
    %c0_44 = arith.constant 0 : index
    %74 = vector.load %arg14[%c0_42, %c0_43, %c0_44] : memref<2x1x128xf32, #tpu.memory_space<vmem>>, vector<1x1x128xf32>
    %75 = vector.shape_cast %74 : vector<1x1x128xf32> to vector<1x128xf32>
    %76 = vector.broadcast %75 : vector<1x128xf32> to vector<16x128xf32>
    %77 = arith.addf %73, %76 : vector<16x128xf32>
    %c0_45 = arith.constant 0 : index
    %c0_46 = arith.constant 0 : index
    %c0_47 = arith.constant 0 : index
    %78 = vector.load %arg15[%c0_45, %c0_46, %c0_47] : memref<2x1x128xf32, #tpu.memory_space<vmem>>, vector<1x1x128xf32>
    %79 = vector.shape_cast %78 : vector<1x1x128xf32> to vector<1x128xf32>
    %c0_48 = arith.constant 0 : index
    %c0_49 = arith.constant 0 : index
    %c0_50 = arith.constant 0 : index
    %80 = vector.load %arg16[%c0_48, %c0_49, %c0_50] : memref<2x1x128xf32, #tpu.memory_space<vmem>>, vector<1x1x128xf32>
    %81 = vector.shape_cast %80 : vector<1x1x128xf32> to vector<1x128xf32>
    %cst_51 = arith.constant dense<0.000000e+00> : vector<16xf32>
    %82 = vector.multi_reduction <add>, %77, %cst_51 [1] : vector<16x128xf32> to vector<16xf32>
    %83 = vector.shape_cast %82 : vector<16xf32> to vector<16x1xf32>
    %cst_52 = arith.constant 3.125000e-02 : f32
    %84 = vector.broadcast %cst_52 : f32 to vector<16x1xf32>
    %85 = arith.mulf %83, %84 : vector<16x1xf32>
    %86 = vector.broadcast %85 : vector<16x1xf32> to vector<16x128xf32>
    %87 = arith.subf %77, %86 : vector<16x128xf32>
    %88 = vector.broadcast %4 : vector<1x128xf32> to vector<16x128xf32>
    %89 = arith.mulf %87, %88 : vector<16x128xf32>
    %90 = arith.mulf %89, %89 : vector<16x128xf32>
    %cst_53 = arith.constant dense<0.000000e+00> : vector<16xf32>
    %91 = vector.multi_reduction <add>, %90, %cst_53 [1] : vector<16x128xf32> to vector<16xf32>
    %92 = vector.shape_cast %91 : vector<16xf32> to vector<16x1xf32>
    %cst_54 = arith.constant 3.125000e-02 : f32
    %93 = vector.broadcast %cst_54 : f32 to vector<16x1xf32>
    %94 = arith.mulf %92, %93 : vector<16x1xf32>
    %cst_55 = arith.constant 9.99999997E-7 : f32
    %95 = vector.broadcast %cst_55 : f32 to vector<16x1xf32>
    %96 = arith.addf %94, %95 : vector<16x1xf32>
    %97 = math.rsqrt %96 : vector<16x1xf32>
    %98 = vector.broadcast %97 : vector<16x1xf32> to vector<16x128xf32>
    %99 = arith.mulf %89, %98 : vector<16x128xf32>
    %100 = vector.broadcast %79 : vector<1x128xf32> to vector<16x128xf32>
    %101 = arith.mulf %99, %100 : vector<16x128xf32>
    %102 = vector.broadcast %81 : vector<1x128xf32> to vector<16x128xf32>
    %103 = arith.addf %101, %102 : vector<16x128xf32>
    %104 = arith.truncf %103 : vector<16x128xf32> to vector<16x128xbf16>
    %c0_56 = arith.constant 0 : index
    %c0_57 = arith.constant 0 : index
    %c0_58 = arith.constant 0 : index
    %105 = vector.load %arg17[%c0_56, %c0_57, %c0_58] : memref<2x128x128xbf16, #tpu.memory_space<vmem>>, vector<1x128x128xbf16>
    %106 = vector.shape_cast %105 : vector<1x128x128xbf16> to vector<128x128xbf16>
    %cst_59 = arith.constant dense<0.000000e+00> : vector<16x128xf32>
    %107 = tpu.matmul %104, %106, %cst_59 {dimension_numbers = #tpu.dot_dimension_numbers<[1], [0], [0], [1], [0, 0, 1, 1], [], []>} : vector<16x128xbf16>, vector<128x128xbf16>, vector<16x128xf32> -> vector<16x128xf32>
    %c0_60 = arith.constant 0 : index
    %c0_61 = arith.constant 0 : index
    %c0_62 = arith.constant 0 : index
    %108 = vector.load %arg18[%c0_60, %c0_61, %c0_62] : memref<2x1x128xf32, #tpu.memory_space<vmem>>, vector<1x1x128xf32>
    %109 = vector.shape_cast %108 : vector<1x1x128xf32> to vector<1x128xf32>
    %110 = vector.broadcast %109 : vector<1x128xf32> to vector<16x128xf32>
    %111 = arith.addf %107, %110 : vector<16x128xf32>
    %112 = arith.mulf %111, %111 : vector<16x128xf32>
    %113 = arith.mulf %111, %112 : vector<16x128xf32>
    %cst_63 = arith.constant 4.471500e-02 : f32
    %114 = vector.broadcast %cst_63 : f32 to vector<16x128xf32>
    %115 = arith.mulf %114, %113 : vector<16x128xf32>
    %116 = arith.addf %111, %115 : vector<16x128xf32>
    %cst_64 = arith.constant 0.797884583 : f32
    %117 = vector.broadcast %cst_64 : f32 to vector<16x128xf32>
    %118 = arith.mulf %117, %116 : vector<16x128xf32>
    %119 = math.tanh %118 : vector<16x128xf32>
    %cst_65 = arith.constant 1.000000e+00 : f32
    %120 = vector.broadcast %cst_65 : f32 to vector<16x128xf32>
    %121 = arith.addf %120, %119 : vector<16x128xf32>
    %cst_66 = arith.constant 5.000000e-01 : f32
    %122 = vector.broadcast %cst_66 : f32 to vector<16x128xf32>
    %123 = arith.mulf %122, %121 : vector<16x128xf32>
    %124 = arith.mulf %111, %123 : vector<16x128xf32>
    %125 = arith.truncf %124 : vector<16x128xf32> to vector<16x128xbf16>
    %c0_67 = arith.constant 0 : index
    %c0_68 = arith.constant 0 : index
    %c0_69 = arith.constant 0 : index
    %126 = vector.load %arg19[%c0_67, %c0_68, %c0_69] : memref<2x128x128xbf16, #tpu.memory_space<vmem>>, vector<1x128x128xbf16>
    %127 = vector.shape_cast %126 : vector<1x128x128xbf16> to vector<128x128xbf16>
    %cst_70 = arith.constant dense<0.000000e+00> : vector<16x128xf32>
    %128 = tpu.matmul %125, %127, %cst_70 {dimension_numbers = #tpu.dot_dimension_numbers<[1], [0], [0], [1], [0, 0, 1, 1], [], []>} : vector<16x128xbf16>, vector<128x128xbf16>, vector<16x128xf32> -> vector<16x128xf32>
    %129 = arith.addf %77, %128 : vector<16x128xf32>
    %c0_71 = arith.constant 0 : index
    %c0_72 = arith.constant 0 : index
    %c0_73 = arith.constant 0 : index
    %130 = vector.load %arg20[%c0_71, %c0_72, %c0_73] : memref<2x1x128xf32, #tpu.memory_space<vmem>>, vector<1x1x128xf32>
    %131 = vector.shape_cast %130 : vector<1x1x128xf32> to vector<1x128xf32>
    %132 = vector.broadcast %131 : vector<1x128xf32> to vector<16x128xf32>
    %133 = arith.addf %129, %132 : vector<16x128xf32>
    %c1 = arith.constant 1 : index
    %c0_74 = arith.constant 0 : index
    %c0_75 = arith.constant 0 : index
    %134 = vector.load %arg9[%c1, %c0_74, %c0_75] : memref<2x1x128xf32, #tpu.memory_space<vmem>>, vector<1x1x128xf32>
    %135 = vector.shape_cast %134 : vector<1x1x128xf32> to vector<1x128xf32>
    %c1_76 = arith.constant 1 : index
    %c0_77 = arith.constant 0 : index
    %c0_78 = arith.constant 0 : index
    %136 = vector.load %arg10[%c1_76, %c0_77, %c0_78] : memref<2x1x128xf32, #tpu.memory_space<vmem>>, vector<1x1x128xf32>
    %137 = vector.shape_cast %136 : vector<1x1x128xf32> to vector<1x128xf32>
    %cst_79 = arith.constant dense<0.000000e+00> : vector<16xf32>
    %138 = vector.multi_reduction <add>, %133, %cst_79 [1] : vector<16x128xf32> to vector<16xf32>
    %139 = vector.shape_cast %138 : vector<16xf32> to vector<16x1xf32>
    %cst_80 = arith.constant 3.125000e-02 : f32
    %140 = vector.broadcast %cst_80 : f32 to vector<16x1xf32>
    %141 = arith.mulf %139, %140 : vector<16x1xf32>
    %142 = vector.broadcast %141 : vector<16x1xf32> to vector<16x128xf32>
    %143 = arith.subf %133, %142 : vector<16x128xf32>
    %144 = vector.broadcast %4 : vector<1x128xf32> to vector<16x128xf32>
    %145 = arith.mulf %143, %144 : vector<16x128xf32>
    %146 = arith.mulf %145, %145 : vector<16x128xf32>
    %cst_81 = arith.constant dense<0.000000e+00> : vector<16xf32>
    %147 = vector.multi_reduction <add>, %146, %cst_81 [1] : vector<16x128xf32> to vector<16xf32>
    %148 = vector.shape_cast %147 : vector<16xf32> to vector<16x1xf32>
    %cst_82 = arith.constant 3.125000e-02 : f32
    %149 = vector.broadcast %cst_82 : f32 to vector<16x1xf32>
    %150 = arith.mulf %148, %149 : vector<16x1xf32>
    %cst_83 = arith.constant 9.99999997E-7 : f32
    %151 = vector.broadcast %cst_83 : f32 to vector<16x1xf32>
    %152 = arith.addf %150, %151 : vector<16x1xf32>
    %153 = math.rsqrt %152 : vector<16x1xf32>
    %154 = vector.broadcast %153 : vector<16x1xf32> to vector<16x128xf32>
    %155 = arith.mulf %145, %154 : vector<16x128xf32>
    %156 = vector.broadcast %135 : vector<1x128xf32> to vector<16x128xf32>
    %157 = arith.mulf %155, %156 : vector<16x128xf32>
    %158 = vector.broadcast %137 : vector<1x128xf32> to vector<16x128xf32>
    %159 = arith.addf %157, %158 : vector<16x128xf32>
    %160 = arith.truncf %159 : vector<16x128xf32> to vector<16x128xbf16>
    %c1_84 = arith.constant 1 : index
    %c0_85 = arith.constant 0 : index
    %c0_86 = arith.constant 0 : index
    %161 = vector.load %arg11[%c1_84, %c0_85, %c0_86] : memref<2x128x128xbf16, #tpu.memory_space<vmem>>, vector<1x128x128xbf16>
    %162 = vector.shape_cast %161 : vector<1x128x128xbf16> to vector<128x128xbf16>
    %cst_87 = arith.constant dense<0.000000e+00> : vector<16x128xf32>
    %163 = tpu.matmul %160, %162, %cst_87 {dimension_numbers = #tpu.dot_dimension_numbers<[1], [0], [0], [1], [0, 0, 1, 1], [], []>} : vector<16x128xbf16>, vector<128x128xbf16>, vector<16x128xf32> -> vector<16x128xf32>
    %c1_88 = arith.constant 1 : index
    %c0_89 = arith.constant 0 : index
    %c0_90 = arith.constant 0 : index
    %164 = vector.load %arg12[%c1_88, %c0_89, %c0_90] : memref<2x1x128xf32, #tpu.memory_space<vmem>>, vector<1x1x128xf32>
    %165 = vector.shape_cast %164 : vector<1x1x128xf32> to vector<1x128xf32>
    %166 = vector.broadcast %165 : vector<1x128xf32> to vector<16x128xf32>
    %167 = arith.addf %163, %166 : vector<16x128xf32>
    %168 = tpu.concatenate %167, %167, %167, %167 in 0 : vector<16x128xf32>, vector<16x128xf32>, vector<16x128xf32>, vector<16x128xf32> -> vector<64x128xf32>
    %c64_i32_91 = arith.constant 64 : i32
    %169 = tpu.dynamic_rotate %168 by %c64_i32_91 dim 1 : vector<64x128xf32>, i32 -> vector<64x128xf32>
    %170 = arith.mulf %169, %1 : vector<64x128xf32>
    %171 = arith.mulf %168, %2 : vector<64x128xf32>
    %172 = arith.truncf %167 : vector<16x128xf32> to vector<16x128xbf16>
    %173 = arith.truncf %170 : vector<64x128xf32> to vector<64x128xbf16>
    "tpu.trace_start"() <{level = 10 : i32, message = "qc,kc->qk"}> : () -> ()
    %cst_92 = arith.constant dense<0.000000e+00> : vector<16x64xf32>
    %174 = tpu.matmul %172, %173, %cst_92 {dimension_numbers = #tpu.dot_dimension_numbers<[1], [1], [0], [0], [0, 0, 1, 0], [], []>} : vector<16x128xbf16>, vector<64x128xbf16>, vector<16x64xf32> -> vector<16x64xf32>
    "tpu.trace_stop"() : () -> ()
    %cst_93 = arith.constant 0.353553385 : f32
    %175 = vector.broadcast %cst_93 : f32 to vector<16x64xf32>
    %176 = arith.mulf %174, %175 : vector<16x64xf32>
    %177 = arith.addf %176, %0 : vector<16x64xf32>
    %cst_94 = arith.constant dense<0xFF800000> : vector<16xf32>
    %178 = vector.multi_reduction <maximumf>, %177, %cst_94 [1] : vector<16x64xf32> to vector<16xf32>
    %179 = vector.shape_cast %178 : vector<16xf32> to vector<16x1xf32>
    %180 = vector.broadcast %179 : vector<16x1xf32> to vector<16x64xf32>
    %181 = arith.subf %177, %180 : vector<16x64xf32>
    %182 = math.exp %181 : vector<16x64xf32>
    %183 = arith.truncf %182 : vector<16x64xf32> to vector<16x64xbf16>
    %cst_95 = arith.constant dense<0.000000e+00> : vector<16x128xf32>
    %184 = tpu.matmul %183, %3, %cst_95 {dimension_numbers = #tpu.dot_dimension_numbers<[1], [0], [0], [1], [0, 0, 1, 1], [], []>} : vector<16x64xbf16>, vector<64x128xbf16>, vector<16x128xf32> -> vector<16x128xf32>
    %185 = vector.broadcast %5 : vector<1x128xf32> to vector<16x128xf32>
    %186 = arith.addf %184, %185 : vector<16x128xf32>
    %187 = arith.truncf %171 : vector<64x128xf32> to vector<64x128xbf16>
    %cst_96 = arith.constant dense<0.000000e+00> : vector<16x128xf32>
    %188 = tpu.matmul %183, %187, %cst_96 {dimension_numbers = #tpu.dot_dimension_numbers<[1], [0], [0], [1], [0, 0, 1, 1], [], []>} : vector<16x64xbf16>, vector<64x128xbf16>, vector<16x128xf32> -> vector<16x128xf32>
    %189 = tpu.reciprocal %186 {approx = true} : vector<16x128xf32> -> vector<16x128xf32>
    %190 = arith.mulf %188, %189 : vector<16x128xf32>
    %191 = arith.truncf %190 : vector<16x128xf32> to vector<16x128xbf16>
    %c1_97 = arith.constant 1 : index
    %c0_98 = arith.constant 0 : index
    %c0_99 = arith.constant 0 : index
    %192 = vector.load %arg13[%c1_97, %c0_98, %c0_99] : memref<2x128x128xbf16, #tpu.memory_space<vmem>>, vector<1x128x128xbf16>
    %193 = vector.shape_cast %192 : vector<1x128x128xbf16> to vector<128x128xbf16>
    %cst_100 = arith.constant dense<0.000000e+00> : vector<16x128xf32>
    %194 = tpu.matmul %191, %193, %cst_100 {dimension_numbers = #tpu.dot_dimension_numbers<[1], [0], [0], [1], [0, 0, 1, 1], [], []>} : vector<16x128xbf16>, vector<128x128xbf16>, vector<16x128xf32> -> vector<16x128xf32>
    %195 = arith.addf %133, %194 : vector<16x128xf32>
    %c1_101 = arith.constant 1 : index
    %c0_102 = arith.constant 0 : index
    %c0_103 = arith.constant 0 : index
    %196 = vector.load %arg14[%c1_101, %c0_102, %c0_103] : memref<2x1x128xf32, #tpu.memory_space<vmem>>, vector<1x1x128xf32>
    %197 = vector.shape_cast %196 : vector<1x1x128xf32> to vector<1x128xf32>
    %198 = vector.broadcast %197 : vector<1x128xf32> to vector<16x128xf32>
    %199 = arith.addf %195, %198 : vector<16x128xf32>
    %c1_104 = arith.constant 1 : index
    %c0_105 = arith.constant 0 : index
    %c0_106 = arith.constant 0 : index
    %200 = vector.load %arg15[%c1_104, %c0_105, %c0_106] : memref<2x1x128xf32, #tpu.memory_space<vmem>>, vector<1x1x128xf32>
    %201 = vector.shape_cast %200 : vector<1x1x128xf32> to vector<1x128xf32>
    %c1_107 = arith.constant 1 : index
    %c0_108 = arith.constant 0 : index
    %c0_109 = arith.constant 0 : index
    %202 = vector.load %arg16[%c1_107, %c0_108, %c0_109] : memref<2x1x128xf32, #tpu.memory_space<vmem>>, vector<1x1x128xf32>
    %203 = vector.shape_cast %202 : vector<1x1x128xf32> to vector<1x128xf32>
    %cst_110 = arith.constant dense<0.000000e+00> : vector<16xf32>
    %204 = vector.multi_reduction <add>, %199, %cst_110 [1] : vector<16x128xf32> to vector<16xf32>
    %205 = vector.shape_cast %204 : vector<16xf32> to vector<16x1xf32>
    %cst_111 = arith.constant 3.125000e-02 : f32
    %206 = vector.broadcast %cst_111 : f32 to vector<16x1xf32>
    %207 = arith.mulf %205, %206 : vector<16x1xf32>
    %208 = vector.broadcast %207 : vector<16x1xf32> to vector<16x128xf32>
    %209 = arith.subf %199, %208 : vector<16x128xf32>
    %210 = vector.broadcast %4 : vector<1x128xf32> to vector<16x128xf32>
    %211 = arith.mulf %209, %210 : vector<16x128xf32>
    %212 = arith.mulf %211, %211 : vector<16x128xf32>
    %cst_112 = arith.constant dense<0.000000e+00> : vector<16xf32>
    %213 = vector.multi_reduction <add>, %212, %cst_112 [1] : vector<16x128xf32> to vector<16xf32>
    %214 = vector.shape_cast %213 : vector<16xf32> to vector<16x1xf32>
    %cst_113 = arith.constant 3.125000e-02 : f32
    %215 = vector.broadcast %cst_113 : f32 to vector<16x1xf32>
    %216 = arith.mulf %214, %215 : vector<16x1xf32>
    %cst_114 = arith.constant 9.99999997E-7 : f32
    %217 = vector.broadcast %cst_114 : f32 to vector<16x1xf32>
    %218 = arith.addf %216, %217 : vector<16x1xf32>
    %219 = math.rsqrt %218 : vector<16x1xf32>
    %220 = vector.broadcast %219 : vector<16x1xf32> to vector<16x128xf32>
    %221 = arith.mulf %211, %220 : vector<16x128xf32>
    %222 = vector.broadcast %201 : vector<1x128xf32> to vector<16x128xf32>
    %223 = arith.mulf %221, %222 : vector<16x128xf32>
    %224 = vector.broadcast %203 : vector<1x128xf32> to vector<16x128xf32>
    %225 = arith.addf %223, %224 : vector<16x128xf32>
    %226 = arith.truncf %225 : vector<16x128xf32> to vector<16x128xbf16>
    %c1_115 = arith.constant 1 : index
    %c0_116 = arith.constant 0 : index
    %c0_117 = arith.constant 0 : index
    %227 = vector.load %arg17[%c1_115, %c0_116, %c0_117] : memref<2x128x128xbf16, #tpu.memory_space<vmem>>, vector<1x128x128xbf16>
    %228 = vector.shape_cast %227 : vector<1x128x128xbf16> to vector<128x128xbf16>
    %cst_118 = arith.constant dense<0.000000e+00> : vector<16x128xf32>
    %229 = tpu.matmul %226, %228, %cst_118 {dimension_numbers = #tpu.dot_dimension_numbers<[1], [0], [0], [1], [0, 0, 1, 1], [], []>} : vector<16x128xbf16>, vector<128x128xbf16>, vector<16x128xf32> -> vector<16x128xf32>
    %c1_119 = arith.constant 1 : index
    %c0_120 = arith.constant 0 : index
    %c0_121 = arith.constant 0 : index
    %230 = vector.load %arg18[%c1_119, %c0_120, %c0_121] : memref<2x1x128xf32, #tpu.memory_space<vmem>>, vector<1x1x128xf32>
    %231 = vector.shape_cast %230 : vector<1x1x128xf32> to vector<1x128xf32>
    %232 = vector.broadcast %231 : vector<1x128xf32> to vector<16x128xf32>
    %233 = arith.addf %229, %232 : vector<16x128xf32>
    %234 = arith.mulf %233, %233 : vector<16x128xf32>
    %235 = arith.mulf %233, %234 : vector<16x128xf32>
    %cst_122 = arith.constant 4.471500e-02 : f32
    %236 = vector.broadcast %cst_122 : f32 to vector<16x128xf32>
    %237 = arith.mulf %236, %235 : vector<16x128xf32>
    %238 = arith.addf %233, %237 : vector<16x128xf32>
    %cst_123 = arith.constant 0.797884583 : f32
    %239 = vector.broadcast %cst_123 : f32 to vector<16x128xf32>
    %240 = arith.mulf %239, %238 : vector<16x128xf32>
    %241 = math.tanh %240 : vector<16x128xf32>
    %cst_124 = arith.constant 1.000000e+00 : f32
    %242 = vector.broadcast %cst_124 : f32 to vector<16x128xf32>
    %243 = arith.addf %242, %241 : vector<16x128xf32>
    %cst_125 = arith.constant 5.000000e-01 : f32
    %244 = vector.broadcast %cst_125 : f32 to vector<16x128xf32>
    %245 = arith.mulf %244, %243 : vector<16x128xf32>
    %246 = arith.mulf %233, %245 : vector<16x128xf32>
    %247 = arith.truncf %246 : vector<16x128xf32> to vector<16x128xbf16>
    %c1_126 = arith.constant 1 : index
    %c0_127 = arith.constant 0 : index
    %c0_128 = arith.constant 0 : index
    %248 = vector.load %arg19[%c1_126, %c0_127, %c0_128] : memref<2x128x128xbf16, #tpu.memory_space<vmem>>, vector<1x128x128xbf16>
    %249 = vector.shape_cast %248 : vector<1x128x128xbf16> to vector<128x128xbf16>
    %cst_129 = arith.constant dense<0.000000e+00> : vector<16x128xf32>
    %250 = tpu.matmul %247, %249, %cst_129 {dimension_numbers = #tpu.dot_dimension_numbers<[1], [0], [0], [1], [0, 0, 1, 1], [], []>} : vector<16x128xbf16>, vector<128x128xbf16>, vector<16x128xf32> -> vector<16x128xf32>
    %251 = arith.addf %199, %250 : vector<16x128xf32>
    %c1_130 = arith.constant 1 : index
    %c0_131 = arith.constant 0 : index
    %c0_132 = arith.constant 0 : index
    %252 = vector.load %arg20[%c1_130, %c0_131, %c0_132] : memref<2x1x128xf32, #tpu.memory_space<vmem>>, vector<1x1x128xf32>
    %253 = vector.shape_cast %252 : vector<1x1x128xf32> to vector<1x128xf32>
    %254 = vector.broadcast %253 : vector<1x128xf32> to vector<16x128xf32>
    %255 = arith.addf %251, %254 : vector<16x128xf32>
    %c0_133 = arith.constant 0 : index
    %c0_134 = arith.constant 0 : index
    %256 = vector.load %arg21[%c0_133, %c0_134] : memref<1x128xf32, #tpu.memory_space<vmem>>, vector<1x128xf32>
    %c0_135 = arith.constant 0 : index
    %c0_136 = arith.constant 0 : index
    %257 = vector.load %arg22[%c0_135, %c0_136] : memref<1x128xf32, #tpu.memory_space<vmem>>, vector<1x128xf32>
    %cst_137 = arith.constant dense<0.000000e+00> : vector<16xf32>
    %258 = vector.multi_reduction <add>, %255, %cst_137 [1] : vector<16x128xf32> to vector<16xf32>
    %259 = vector.shape_cast %258 : vector<16xf32> to vector<16x1xf32>
    %cst_138 = arith.constant 3.125000e-02 : f32
    %260 = vector.broadcast %cst_138 : f32 to vector<16x1xf32>
    %261 = arith.mulf %259, %260 : vector<16x1xf32>
    %262 = vector.broadcast %261 : vector<16x1xf32> to vector<16x128xf32>
    %263 = arith.subf %255, %262 : vector<16x128xf32>
    %264 = vector.broadcast %4 : vector<1x128xf32> to vector<16x128xf32>
    %265 = arith.mulf %263, %264 : vector<16x128xf32>
    %266 = arith.mulf %265, %265 : vector<16x128xf32>
    %cst_139 = arith.constant dense<0.000000e+00> : vector<16xf32>
    %267 = vector.multi_reduction <add>, %266, %cst_139 [1] : vector<16x128xf32> to vector<16xf32>
    %268 = vector.shape_cast %267 : vector<16xf32> to vector<16x1xf32>
    %cst_140 = arith.constant 3.125000e-02 : f32
    %269 = vector.broadcast %cst_140 : f32 to vector<16x1xf32>
    %270 = arith.mulf %268, %269 : vector<16x1xf32>
    %cst_141 = arith.constant 9.99999997E-7 : f32
    %271 = vector.broadcast %cst_141 : f32 to vector<16x1xf32>
    %272 = arith.addf %270, %271 : vector<16x1xf32>
    %273 = math.rsqrt %272 : vector<16x1xf32>
    %274 = vector.broadcast %273 : vector<16x1xf32> to vector<16x128xf32>
    %275 = arith.mulf %265, %274 : vector<16x128xf32>
    %276 = vector.broadcast %256 : vector<1x128xf32> to vector<16x128xf32>
    %277 = arith.mulf %275, %276 : vector<16x128xf32>
    %278 = vector.broadcast %257 : vector<1x128xf32> to vector<16x128xf32>
    %279 = arith.addf %277, %278 : vector<16x128xf32>
    %280 = arith.truncf %279 : vector<16x128xf32> to vector<16x128xbf16>
    %c0_142 = arith.constant 0 : index
    %c0_143 = arith.constant 0 : index
    %281 = vector.load %arg23[%c0_142, %c0_143] : memref<128x128xbf16, #tpu.memory_space<vmem>>, vector<128x128xbf16>
    %cst_144 = arith.constant dense<0.000000e+00> : vector<16x128xf32>
    %282 = tpu.matmul %280, %281, %cst_144 {dimension_numbers = #tpu.dot_dimension_numbers<[1], [0], [0], [1], [0, 0, 1, 1], [], []>} : vector<16x128xbf16>, vector<128x128xbf16>, vector<16x128xf32> -> vector<16x128xf32>
    %c0_145 = arith.constant 0 : index
    %c0_146 = arith.constant 0 : index
    %283 = vector.load %arg24[%c0_145, %c0_146] : memref<1x128xf32, #tpu.memory_space<vmem>>, vector<1x128xf32>
    %284 = vector.broadcast %283 : vector<1x128xf32> to vector<16x128xf32>
    %285 = arith.addf %282, %284 : vector<16x128xf32>
    %cst_147 = arith.constant 0.000000e+00 : f32
    %286 = vector.broadcast %cst_147 : f32 to vector<16x128xf32>
    %287 = arith.maximumf %285, %286 : vector<16x128xf32>
    %288 = arith.truncf %287 : vector<16x128xf32> to vector<16x128xbf16>
    %c0_148 = arith.constant 0 : index
    %c0_149 = arith.constant 0 : index
    %289 = vector.load %arg25[%c0_148, %c0_149] : memref<128x128xbf16, #tpu.memory_space<vmem>>, vector<128x128xbf16>
    %cst_150 = arith.constant dense<0.000000e+00> : vector<16x128xf32>
    %290 = tpu.matmul %288, %289, %cst_150 {dimension_numbers = #tpu.dot_dimension_numbers<[1], [0], [0], [1], [0, 0, 1, 1], [], []>} : vector<16x128xbf16>, vector<128x128xbf16>, vector<16x128xf32> -> vector<16x128xf32>
    %c0_151 = arith.constant 0 : index
    %c0_152 = arith.constant 0 : index
    %291 = vector.load %arg26[%c0_151, %c0_152] : memref<1x128xf32, #tpu.memory_space<vmem>>, vector<1x128xf32>
    %292 = vector.broadcast %291 : vector<1x128xf32> to vector<16x128xf32>
    %293 = arith.addf %290, %292 : vector<16x128xf32>
    %294 = arith.negf %293 : vector<16x128xf32>
    %295 = math.exp %294 : vector<16x128xf32>
    %cst_153 = arith.constant 1.000000e+00 : f32
    %296 = vector.broadcast %cst_153 : f32 to vector<16x128xf32>
    %297 = arith.addf %296, %295 : vector<16x128xf32>
    %298 = arith.divf %296, %297 : vector<16x128xf32>
    %c0_154 = arith.constant 0 : index
    %c0_155 = arith.constant 0 : index
    %299 = vector.load %arg27[%c0_154, %c0_155] : memref<16x128xf32, #tpu.memory_space<vmem>>, vector<16x128xf32>
    tpu.vector_store %arg27[%c0_154, %c0_155], %298 {strides = array<i32>} : memref<16x128xf32, #tpu.memory_space<vmem>>, vector<16x128xf32>,
    return
  }
  func.func @transform_0(%arg0: i32) -> (i32, i32) {
    %c0_i32 = arith.constant 0 : i32
    %c0_i32_0 = arith.constant 0 : i32
    %c0_i32_1 = arith.constant 0 : i32
    return %c0_i32, %c0_i32_0 : i32, i32
  }
  func.func @transform_1(%arg0: i32) -> (i32, i32) {
    %c0_i32 = arith.constant 0 : i32
    %c0_i32_0 = arith.constant 0 : i32
    %c0_i32_1 = arith.constant 0 : i32
    return %c0_i32, %c0_i32_0 : i32, i32
  }
  func.func @transform_2(%arg0: i32) -> (i32, i32) {
    %c0_i32 = arith.constant 0 : i32
    %c0_i32_0 = arith.constant 0 : i32
    %c0_i32_1 = arith.constant 0 : i32
    return %c0_i32, %c0_i32_0 : i32, i32
  }
  func.func @transform_3(%arg0: i32) -> (i32, i32) {
    %c0_i32 = arith.constant 0 : i32
    %c0_i32_0 = arith.constant 0 : i32
    %c0_i32_1 = arith.constant 0 : i32
    return %c0_i32, %c0_i32_0 : i32, i32
  }
  func.func @transform_4(%arg0: i32) -> (i32, i32) {
    %c0_i32 = arith.constant 0 : i32
    %c0_i32_0 = arith.constant 0 : i32
    %c0_i32_1 = arith.constant 0 : i32
    return %c0_i32, %c0_i32_0 : i32, i32
  }
  func.func @transform_5(%arg0: i32) -> (i32, i32) {
    %c0_i32 = arith.constant 0 : i32
    %c0_i32_0 = arith.constant 0 : i32
    %c0_i32_1 = arith.constant 0 : i32
    return %c0_i32, %c0_i32_0 : i32, i32
  }
  func.func @transform_6(%arg0: i32) -> (i32, i32) {
    %c0_i32 = arith.constant 0 : i32
    %c0_i32_0 = arith.constant 0 : i32
    %c0_i32_1 = arith.constant 0 : i32
    return %c0_i32, %c0_i32_0 : i32, i32
  }
  func.func @transform_7(%arg0: i32) -> (i32, i32) {
    %c0_i32 = arith.constant 0 : i32
    %c0_i32_0 = arith.constant 0 : i32
    %c0_i32_1 = arith.constant 0 : i32
    return %c0_i32, %c0_i32_0 : i32, i32
  }
  func.func @transform_8(%arg0: i32) -> (i32, i32, i32) {
    %c0_i32 = arith.constant 0 : i32
    %c0_i32_0 = arith.constant 0 : i32
    %c0_i32_1 = arith.constant 0 : i32
    %c0_i32_2 = arith.constant 0 : i32
    return %c0_i32, %c0_i32_0, %c0_i32_1 : i32, i32, i32
  }
  func.func @transform_9(%arg0: i32) -> (i32, i32, i32) {
    %c0_i32 = arith.constant 0 : i32
    %c0_i32_0 = arith.constant 0 : i32
    %c0_i32_1 = arith.constant 0 : i32
    %c0_i32_2 = arith.constant 0 : i32
    return %c0_i32, %c0_i32_0, %c0_i32_1 : i32, i32, i32
  }
  func.func @transform_10(%arg0: i32) -> (i32, i32, i32) {
    %c0_i32 = arith.constant 0 : i32
    %c0_i32_0 = arith.constant 0 : i32
    %c0_i32_1 = arith.constant 0 : i32
    %c0_i32_2 = arith.constant 0 : i32
    return %c0_i32, %c0_i32_0, %c0_i32_1 : i32, i32, i32
  }
  func.func @transform_11(%arg0: i32) -> (i32, i32, i32) {
    %c0_i32 = arith.constant 0 : i32
    %c0_i32_0 = arith.constant 0 : i32
    %c0_i32_1 = arith.constant 0 : i32
    %c0_i32_2 = arith.constant 0 : i32
    return %c0_i32, %c0_i32_0, %c0_i32_1 : i32, i32, i32
  }
  func.func @transform_12(%arg0: i32) -> (i32, i32, i32) {
    %c0_i32 = arith.constant 0 : i32
    %c0_i32_0 = arith.constant 0 : i32
    %c0_i32_1 = arith.constant 0 : i32
    %c0_i32_2 = arith.constant 0 : i32
    return %c0_i32, %c0_i32_0, %c0_i32_1 : i32, i32, i32
  }
  func.func @transform_13(%arg0: i32) -> (i32, i32, i32) {
    %c0_i32 = arith.constant 0 : i32
    %c0_i32_0 = arith.constant 0 : i32
    %c0_i32_1 = arith.constant 0 : i32
    %c0_i32_2 = arith.constant 0 : i32
    return %c0_i32, %c0_i32_0, %c0_i32_1 : i32, i32, i32
  }
  func.func @transform_14(%arg0: i32) -> (i32, i32, i32) {
    %c0_i32 = arith.constant 0 : i32
    %c0_i32_0 = arith.constant 0 : i32
    %c0_i32_1 = arith.constant 0 : i32
    %c0_i32_2 = arith.constant 0 : i32
    return %c0_i32, %c0_i32_0, %c0_i32_1 : i32, i32, i32
  }
  func.func @transform_15(%arg0: i32) -> (i32, i32, i32) {
    %c0_i32 = arith.constant 0 : i32
    %c0_i32_0 = arith.constant 0 : i32
    %c0_i32_1 = arith.constant 0 : i32
    %c0_i32_2 = arith.constant 0 : i32
    return %c0_i32, %c0_i32_0, %c0_i32_1 : i32, i32, i32
  }
  func.func @transform_16(%arg0: i32) -> (i32, i32, i32) {
    %c0_i32 = arith.constant 0 : i32
    %c0_i32_0 = arith.constant 0 : i32
    %c0_i32_1 = arith.constant 0 : i32
    %c0_i32_2 = arith.constant 0 : i32
    return %c0_i32, %c0_i32_0, %c0_i32_1 : i32, i32, i32
  }
  func.func @transform_17(%arg0: i32) -> (i32, i32, i32) {
    %c0_i32 = arith.constant 0 : i32
    %c0_i32_0 = arith.constant 0 : i32
    %c0_i32_1 = arith.constant 0 : i32
    %c0_i32_2 = arith.constant 0 : i32
    return %c0_i32, %c0_i32_0, %c0_i32_1 : i32, i32, i32
  }
  func.func @transform_18(%arg0: i32) -> (i32, i32, i32) {
    %c0_i32 = arith.constant 0 : i32
    %c0_i32_0 = arith.constant 0 : i32
    %c0_i32_1 = arith.constant 0 : i32
    %c0_i32_2 = arith.constant 0 : i32
    return %c0_i32, %c0_i32_0, %c0_i32_1 : i32, i32, i32
  }
  func.func @transform_19(%arg0: i32) -> (i32, i32, i32) {
    %c0_i32 = arith.constant 0 : i32
    %c0_i32_0 = arith.constant 0 : i32
    %c0_i32_1 = arith.constant 0 : i32
    %c0_i32_2 = arith.constant 0 : i32
    return %c0_i32, %c0_i32_0, %c0_i32_1 : i32, i32, i32
  }
  func.func @transform_20(%arg0: i32) -> (i32, i32) {
    %c0_i32 = arith.constant 0 : i32
    %c0_i32_0 = arith.constant 0 : i32
    %c0_i32_1 = arith.constant 0 : i32
    return %c0_i32, %c0_i32_0 : i32, i32
  }
  func.func @transform_21(%arg0: i32) -> (i32, i32) {
    %c0_i32 = arith.constant 0 : i32
    %c0_i32_0 = arith.constant 0 : i32
    %c0_i32_1 = arith.constant 0 : i32
    return %c0_i32, %c0_i32_0 : i32, i32
  }
  func.func @transform_22(%arg0: i32) -> (i32, i32) {
    %c0_i32 = arith.constant 0 : i32
    %c0_i32_0 = arith.constant 0 : i32
    %c0_i32_1 = arith.constant 0 : i32
    return %c0_i32, %c0_i32_0 : i32, i32
  }
  func.func @transform_23(%arg0: i32) -> (i32, i32) {
    %c0_i32 = arith.constant 0 : i32
    %c0_i32_0 = arith.constant 0 : i32
    %c0_i32_1 = arith.constant 0 : i32
    return %c0_i32, %c0_i32_0 : i32, i32
  }
  func.func @transform_24(%arg0: i32) -> (i32, i32) {
    %c0_i32 = arith.constant 0 : i32
    %c0_i32_0 = arith.constant 0 : i32
    %c0_i32_1 = arith.constant 0 : i32
    return %c0_i32, %c0_i32_0 : i32, i32
  }
  func.func @transform_25(%arg0: i32) -> (i32, i32) {
    %c0_i32 = arith.constant 0 : i32
    %c0_i32_0 = arith.constant 0 : i32
    %c0_i32_1 = arith.constant 0 : i32
    return %c0_i32, %c0_i32_0 : i32, i32
  }
  func.func @transform_26(%arg0: i32) -> (i32, i32) {
    %c0_i32 = arith.constant 0 : i32
    %c0_i32_0 = arith.constant 0 : i32
    %c0_i32_1 = arith.constant 0 : i32
    return %c0_i32, %c0_i32_0 : i32, i32
  }
}

</mosaic_0001>

<bundles_post_ra>
// kernel: forward.1
= control target key start
LH: loop header
LB: loop body
LE: loop exit
PB: predicated region body
PF: predicated region fallthrough
CT: control target
= control target key end

     0   :  { %vm779_vm6 = vcmask 523264   ;;  %s3661_s6 = inlined_call_operand.vmem [shape: bf16[768,128], index: 6, kind: input, shape index: {}]   ;;  %s3662_s0 = inlined_call_operand.vmem [shape: f32[16,768], index: 0, kind: input, shape index: {}]   ;;  %s3663_s7 = inlined_call_operand.vmem [shape: f32[16,128], index: 7, kind: input, shape index: {}]   ;;  %s3664_s4 = inlined_call_operand.vmem [shape: f32[1,128], index: 4, kind: input, shape index: {}]   ;;  %s3665_s8 = inlined_call_operand.vmem [shape: f32[2,1,128], index: 8, kind: input, shape index: {}]   ;;  %s3666_s9 = inlined_call_operand.vmem [shape: f32[2,1,128], index: 9, kind: input, shape index: {}]   ;;  %s3667_s11 = inlined_call_operand.vmem [shape: f32[2,1,128], index: 11, kind: input, shape index: {}]   ;;  %s3668_s10 = inlined_call_operand.vmem [shape: bf16[2,128,128], index: 10, kind: input, shape index: {}]   ;;  %s3669_s3 = inlined_call_operand.vmem [shape: f32[64,128], index: 3, kind: input, shape index: {}]   ;;  %s3670_s2 = inlined_call_operand.vmem [shape: f32[64,128], index: 2, kind: input, shape index: {}]   ;;  %s3671_s1 = inlined_call_operand.vmem [shape: f32[16,64], index: 1, kind: input, shape index: {}]   ;;  %s3672_s5 = inlined_call_operand.vmem [shape: f32[1,128], index: 5, kind: input, shape index: {}]   ;;  %s3673_s12 = inlined_call_operand.vmem [shape: bf16[2,128,128], index: 12, kind: input, shape index: {}]   ;;  %s3674_s13 = inlined_call_operand.vmem [shape: f32[2,1,128], index: 13, kind: input, shape index: {}]   ;;  %s3675_s14 = inlined_call_operand.vmem [shape: f32[2,1,128], index: 14, kind: input, shape index: {}]   ;;  %s3676_s15 = inlined_call_operand.vmem [shape: f32[2,1,128], index: 15, kind: input, shape index: {}]   ;;  %s3677_s17 = inlined_call_operand.vmem [shape: f32[2,1,128], index: 17, kind: input, shape index: {}]   ;;  %s3678_s16 = inlined_call_operand.vmem [shape: bf16[2,128,128], index: 16, kind: input, shape index: {}]   ;;  %s3679_s19 = inlined_call_operand.vmem [shape: f32[2,1,128], index: 19, kind: input, shape index: {}]   ;;  %s3680_s18 = inlined_call_operand.vmem [shape: bf16[2,128,128], index: 18, kind: input, shape index: {}]   ;;  %s3681_s20 = inlined_call_operand.vmem [shape: f32[1,128], index: 20, kind: input, shape index: {}]   ;;  %s3682_s21 = inlined_call_operand.vmem [shape: f32[1,128], index: 21, kind: input, shape index: {}]   ;;  %s3683_s23 = inlined_call_operand.vmem [shape: f32[1,128], index: 23, kind: input, shape index: {}]   ;;  %s3684_s22 = inlined_call_operand.vmem [shape: bf16[128,128], index: 22, kind: input, shape index: {}]   ;;  %s3685_s24 = inlined_call_operand.vmem [shape: bf16[128,128], index: 24, kind: input, shape index: {}]   ;;  %s3686_s25 = inlined_call_operand.vmem [shape: f32[1,128], index: 25, kind: input, shape index: {}]   ;;  %s3687_s26 = inlined_call_operand.vmem [shape: f32[16,128], index: 26, kind: output, shape index: {}]  }
   0x1   :  { %3702 = sst [smem:[#allocation2_spill]] %s3661_s6 }
   0x2   :  { %3703 = sst [smem:[#allocation3_spill]] %s3662_s0 }
   0x3   :  { %3704 = sst [smem:[#allocation4_spill]] %s3663_s7 }
   0x4   :  { %3705 = sst [smem:[#allocation5_spill]] %s3664_s4 }
   0x5   :  { %3706 = sst [smem:[#allocation6_spill]] %s3665_s8 }
   0x6   :  { %3707 = sst [smem:[#allocation7_spill]] %s3666_s9 }
   0x7   :  { %3708 = sst [smem:[#allocation8_spill]] %s3667_s11 }
   0x8   :  { %3709 = sst [smem:[#allocation9_spill]] %s3668_s10 }
   0x9   :  { %3710 = sst [smem:[#allocation10_spill]] %s3669_s3  ;;  %s3699_s3 = smov 64  }
   0xa   :  { %3711 = sst [smem:[#allocation11_spill]] %s3670_s2 }
   0xb   :  { %3712 = sst [smem:[#allocation12_spill]] %s3671_s1 }
   0xc   :  { %3713 = sst [smem:[#allocation13_spill]] %s3687_s26 }
   0xd   :  { %s3714_s10 = sld [smem:[#allocation2_spill]] }
   0xe   :  { %s3715_s29 = sld [smem:[#allocation3_spill]] }
   0xf   :  { %s3716_s27 = sld [smem:[#allocation4_spill]] }
  0x10   :  { %s3717_s8 = sld [smem:[#allocation5_spill]] }
  0x11   :  { %s3718_s30 = sld [smem:[#allocation9_spill]] }
  0x12   :  { %s3719_s11 = sld [smem:[#allocation6_spill]] }
  0x13   :  { %v2600_v0 = vld [vmem:[%s3714_s10 + $0x38] sm:$0xff]  ;;  %v2599_v4 = vld [vmem:[%s3714_s10 + $0x30] sm:$0xff]  ;;  %v2598_v8 = vld [vmem:[%s3714_s10 + $0x28] sm:$0xff]  ;;  %s3722_s1 = sld [smem:[#allocation10_spill]] }
  0x14   :  { %v2608_v1 = vld [vmem:[%s3714_s10 + $0x78] sm:$0xff]  ;;  %512 = vmatpush.bf16.msra.mxu0 %v2600_v0  ;;  %v2607_v5 = vld [vmem:[%s3714_s10 + $0x70] sm:$0xff]  ;;  %v2606_v9 = vld [vmem:[%s3714_s10 + $0x68] sm:$0xff]  ;;  %s3724_s2 = sld [smem:[#allocation11_spill]] }
  0x15   :  { %v2616_v2 = vld [vmem:[%s3714_s10 + $0xb8] sm:$0xff]  ;;  %526 = vmatpush.bf16.msra.mxu1 %v2608_v1  ;;  %v2615_v6 = vld [vmem:[%s3714_s10 + $0xb0] sm:$0xff]  ;;  %v2614_v10 = vld [vmem:[%s3714_s10 + $0xa8] sm:$0xff]  ;;  %s3725_s6 = sld [smem:[#allocation12_spill]] }
  0x16   :  { %v2624_v3 = vld [vmem:[%s3714_s10 + $0xf8] sm:$0xff]  ;;  %540 = vmatpush.bf16.msra.mxu2 %v2616_v2  ;;  %v2623_v7 = vld [vmem:[%s3714_s10 + $0xf0] sm:$0xff]  ;;  %v2622_v11 = vld [vmem:[%s3714_s10 + $0xe8] sm:$0xff] }
  0x17   :  { %554 = vmatpush.bf16.msra.mxu3 %v2624_v3  ;;  %v2597_v12 = vld [vmem:[%s3714_s10 + $0x20] sm:$0xff]  ;;  %v2596_v16 = vld [vmem:[%s3714_s10 + $0x18] sm:$0xff]  ;;  %v2595_v20 = vld [vmem:[%s3714_s10 + $0x10] sm:$0xff] }
  0x18   :  { %513 = vmatpush.bf16.msra.mxu0 %v2599_v4  ;;  %v2605_v13 = vld [vmem:[%s3714_s10 + $0x60] sm:$0xff]  ;;  %v2604_v17 = vld [vmem:[%s3714_s10 + $0x58] sm:$0xff]  ;;  %v2603_v21 = vld [vmem:[%s3714_s10 + $0x50] sm:$0xff] }
  0x19   :  { %527 = vmatpush.bf16.msra.mxu1 %v2607_v5  ;;  %v2613_v14 = vld [vmem:[%s3714_s10 + $0xa0] sm:$0xff]  ;;  %v2612_v18 = vld [vmem:[%s3714_s10 + $0x98] sm:$0xff]  ;;  %v2611_v22 = vld [vmem:[%s3714_s10 + $0x90] sm:$0xff] }
  0x1a   :  { %541 = vmatpush.bf16.msra.mxu2 %v2615_v6  ;;  %v2621_v15 = vld [vmem:[%s3714_s10 + $0xe0] sm:$0xff]  ;;  %v2620_v19 = vld [vmem:[%s3714_s10 + $0xd8] sm:$0xff]  ;;  %v2619_v23 = vld [vmem:[%s3714_s10 + $0xd0] sm:$0xff] }
  0x1b   :  { %555 = vmatpush.bf16.msra.mxu3 %v2623_v7  ;;  %v2594_v24 = vld [vmem:[%s3714_s10 + $0x8] sm:$0xff]  ;;  %v2593_v28 = vld [vmem:[%s3714_s10] sm:$0xff]  ;;  %v114_v31 = vld [vmem:[%s3715_s29 + $0x30] sm:$0xff] }
  0x1c   :  { %514 = vmatpush.bf16.msra.mxu0 %v2598_v8  ;;  %v2602_v25 = vld [vmem:[%s3714_s10 + $0x48] sm:$0xff]  ;;  %v2601_v29 = vld [vmem:[%s3714_s10 + $0x40] sm:$0xff]  ;;  %v115_v33 = vld [vmem:[%s3715_s29 + $0x38] sm:$0xff] }
  0x1d   :  { %528 = vmatpush.bf16.msra.mxu1 %v2606_v9  ;;  %v2610_v26 = vld [vmem:[%s3714_s10 + $0x88] sm:$0xff]  ;;  %v108_v30 = vld [vmem:[%s3715_s29] sm:$0xff]  ;;  %v2632_v34 = vld [vmem:[%s3714_s10 + $0x138] sm:$0xff] }
  0x1e   :  { %542 = vmatpush.bf16.msra.mxu2 %v2614_v10  ;;  %v2618_v27 = vld [vmem:[%s3714_s10 + $0xc8] sm:$0xff]  ;;  %v2640_v35 = vld [vmem:[%s3714_s10 + $0x178] sm:$0xff]  ;;  %v2609_v36 = vld [vmem:[%s3714_s10 + $0x80] sm:$0xff]  ;;  %v120_v40 = vpack.c.bf16 %v114_v31, %v108_v30 }
  0x1f   :  { %556 = vmatpush.bf16.msra.mxu3 %v2622_v11  ;;  %v109_v32 = vld [vmem:[%s3715_s29 + $0x8] sm:$0xff]  ;;  %v2617_v37 = vld [vmem:[%s3714_s10 + $0xc0] sm:$0xff]  ;;  %v110_v38 = vld [vmem:[%s3715_s29 + $0x10] sm:$0xff] }
  0x20   :  { %515 = vmatpush.bf16.msra.mxu0 %v2597_v12  ;;  %v116_v39 = vld [vmem:[%s3715_s29 + $0x40] sm:$0xff]  ;;  %v111_v41 = vld [vmem:[%s3715_s29 + $0x18] sm:$0xff]  ;;  %v117_v42 = vld [vmem:[%s3715_s29 + $0x48] sm:$0xff]  ;;  %v121_v43 = vpack.c.bf16 %v115_v33, %v109_v32 }
  0x21   :  { %529 = vmatpush.bf16.msra.mxu1 %v2605_v13  ;;  %v2631_v44 = vld [vmem:[%s3714_s10 + $0x130] sm:$0xff]  ;;  %v122_v46 = vpack.c.bf16 %v116_v39, %v110_v38  ;;  %v123_v47 = vpack.c.bf16 %v117_v42, %v111_v41  ;;  %v2630_v48 = vld [vmem:[%s3714_s10 + $0x128] sm:$0xff]  ;;  %v2629_v50 = vld [vmem:[%s3714_s10 + $0x120] sm:$0xff] }
  0x22   :  { %543 = vmatpush.bf16.msra.mxu2 %v2613_v14  ;;  %v2639_v45 = vld [vmem:[%s3714_s10 + $0x170] sm:$0xff]  ;;  %v2638_v49 = vld [vmem:[%s3714_s10 + $0x168] sm:$0xff]  ;;  %v2637_v51 = vld [vmem:[%s3714_s10 + $0x160] sm:$0xff] }
  0x23   :  { %557 = vmatpush.bf16.msra.mxu3 %v2621_v15  ;;  %v2628_v52 = vld [vmem:[%s3714_s10 + $0x118] sm:$0xff]  ;;  %v2627_v54 = vld [vmem:[%s3714_s10 + $0x110] sm:$0xff]  ;;  %v2626_v56 = vld [vmem:[%s3714_s10 + $0x108] sm:$0xff] }
  0x24   :  { %516 = vmatpush.bf16.msra.mxu0 %v2596_v16  ;;  %v2636_v53 = vld [vmem:[%s3714_s10 + $0x158] sm:$0xff]  ;;  %v2635_v55 = vld [vmem:[%s3714_s10 + $0x150] sm:$0xff]  ;;  %v2634_v57 = vld [vmem:[%s3714_s10 + $0x148] sm:$0xff] }
  0x25   :  { %530 = vmatpush.bf16.msra.mxu1 %v2604_v17  ;;  %v2625_v58 = vld [vmem:[%s3714_s10 + $0x100] sm:$0xff]  ;;  %v118_v61 = vld [vmem:[%s3715_s29 + $0x50] sm:$0xff]  ;;  %v113_v62 = vld [vmem:[%s3715_s29 + $0x28] sm:$0xff] }
  0x26   :  { %544 = vmatpush.bf16.msra.mxu2 %v2612_v18  ;;  %v2633_v59 = vld [vmem:[%s3714_s10 + $0x140] sm:$0xff]  ;;  %v119_v63 = vld [vmem:[%s3715_s29 + $0x58] sm:$0xff]  ;;  %v223_v8 = vld [vmem:[%s3716_s27 + $0x8] sm:$0xff] }
  0x27   :  { %558 = vmatpush.bf16.msra.mxu3 %v2620_v19  ;;  %v112_v60 = vld [vmem:[%s3715_s29 + $0x20] sm:$0xff]  ;;  %v125_v1 = vpack.c.bf16 %v119_v63, %v113_v62  ;;  %v2648_v39 = vld [vmem:[%s3718_s30 + $0x38] sm:$0xff]  ;;  %v2646_v41 = vld [vmem:[%s3718_s30 + $0x28] sm:$0xff]  ;;  %s3721_s29 = sld [smem:[#allocation8_spill]] }
  0x28   :  { %517 = vmatpush.bf16.msra.mxu0 %v2595_v20  ;;  %v124_v0 = vpack.c.bf16 %v118_v61, %v112_v60  ;;  %v222_v4 = vld [vmem:[%s3716_s27] sm:$0xff]  ;;  %s3720_s27 = sld [smem:[#allocation7_spill]] }
  0x29   :  { %531 = vmatpush.bf16.msra.mxu1 %v2603_v21  ;;  %v3128_v30 = vld [vmem:[%s3717_s8] ss:$0 sm:$0xff] }
  0x2a   :  { %545 = vmatpush.bf16.msra.mxu2 %v2611_v22  ;;  %v2645_v42 = vld [vmem:[%s3718_s30 + $0x20] sm:$0xff] }
  0x2b   :  { %559 = vmatpush.bf16.msra.mxu3 %v2619_v23 }
  0x2c   :  { %518 = vmatpush.bf16.msra.mxu0 %v2594_v24 }
  0x2d   :  { %532 = vmatpush.bf16.msra.mxu1 %v2602_v25 }
  0x2e   :  { %546 = vmatpush.bf16.msra.mxu2 %v2610_v26 }
  0x2f   :  { %560 = vmatpush.bf16.msra.mxu3 %v2618_v27 }
  0x30   :  { %519 = vmatpush.bf16.msra.mxu0 %v2593_v28 }
  0x31   :  { %533 = vmatpush.bf16.msra.mxu1 %v2601_v29 }
  0x32   :  { %547 = vmatpush.bf16.msra.mxu2 %v2609_v36 }
  0x33   :  { %561 = vmatpush.bf16.msra.mxu3 %v2617_v37  ;;  %520 = vmatmul.bf16.vlgmr.msra.gmra.mxu0 %v120_v40  ;;  %v2647_v40 = vld [vmem:[%s3718_s30 + $0x30] sm:$0xff] }
  0x34   :  { %568 = vmatpush.bf16.msrb.mxu0 %v2632_v34  ;;  %534 = vmatmul.bf16.vlgmr.msra.gmra.mxu1 %v121_v43  ;;  %v2644_v43 = vld [vmem:[%s3718_s30 + $0x18] sm:$0xff] }
  0x35   :  { %582 = vmatpush.bf16.msrb.mxu1 %v2640_v35  ;;  %548 = vmatmul.bf16.vlgmr.msra.gmra.mxu2 %v122_v46 }
  0x36   :  { %562 = vmatmul.bf16.vlgmr.msra.gmra.mxu3 %v123_v47  ;;  %722 = vmatpush.bf16.msrb.mxu2 %v2648_v39  ;;  %v2641_v47 = vld [vmem:[%s3718_s30] sm:$0xff] }
  0x38   :  { %569 = vmatpush.bf16.msrb.mxu0 %v2631_v44  ;;  %v2643_v44 = vld [vmem:[%s3718_s30 + $0x10] sm:$0xff] }
  0x39   :  { %583 = vmatpush.bf16.msrb.mxu1 %v2639_v45  ;;  %v2642_v45 = vld [vmem:[%s3718_s30 + $0x8] sm:$0xff] }
  0x3a   :  { %723 = vmatpush.bf16.msrb.mxu2 %v2647_v40 }
  0x3c   :  { %570 = vmatpush.bf16.msrb.mxu0 %v2630_v48 }
  0x3d   :  { %584 = vmatpush.bf16.msrb.mxu1 %v2638_v49 }
  0x3e   :  { %724 = vmatpush.bf16.msrb.mxu2 %v2646_v41 }
  0x40   :  { %571 = vmatpush.bf16.msrb.mxu0 %v2629_v50 }
  0x41   :  { %585 = vmatpush.bf16.msrb.mxu1 %v2637_v51 }
  0x42   :  { %725 = vmatpush.bf16.msrb.mxu2 %v2645_v42  ;;  %v3220_v42 = vld [vmem:[%s3724_s2 + $0x30] sm:$0xff] }
  0x44   :  { %572 = vmatpush.bf16.msrb.mxu0 %v2628_v52 }
  0x45   :  { %586 = vmatpush.bf16.msrb.mxu1 %v2636_v53 }
  0x46   :  { %726 = vmatpush.bf16.msrb.mxu2 %v2644_v43  ;;  %v3225_v43 = vld [vmem:[%s3724_s2 + $0x38] sm:$0xff] }
  0x48   :  { %573 = vmatpush.bf16.msrb.mxu0 %v2627_v54 }
  0x49   :  { %587 = vmatpush.bf16.msrb.mxu1 %v2635_v55 }
  0x4a   :  { %727 = vmatpush.bf16.msrb.mxu2 %v2643_v44 }
  0x4c   :  { %574 = vmatpush.bf16.msrb.mxu0 %v2626_v56 }
  0x4d   :  { %588 = vmatpush.bf16.msrb.mxu1 %v2634_v57 }
  0x4e   :  { %728 = vmatpush.bf16.msrb.mxu2 %v2642_v45 }
  0x50   :  { %575 = vmatpush.bf16.msrb.mxu0 %v2625_v58 }
  0x51   :  { %589 = vmatpush.bf16.msrb.mxu1 %v2633_v59 }
  0x52   :  { %729 = vmatpush.bf16.msrb.mxu2 %v2641_v47 }
  0x53   :  { %576 = vmatmul.bf16.vlgmr.msrb.gmra.mxu0 %v124_v0 }
  0x54   :  { %590 = vmatmul.bf16.vlgmr.msrb.gmra.mxu1 %v125_v1 }
  0xb0   :  { %v521_v2 = vpop.f32.mrf.mxu0 }
  0xb1   :  { %v535_v3 = vpop.f32.mrf.mxu1  ;;  %v522_v5 = vadd.f32 %v521_v2, %v222_v4  ;;  %v2723_v2 = vld [vmem:[%s3719_s11] ss:$0 sm:$0xff] }
  0xb3   :  { %v536_v7 = vadd.f32 %v535_v3, %v522_v5 }
  0xb8   :  { %v549_v6 = vpop.f32.mrf.mxu2  ;;  %v523_v9 = vpop.f32.mrf.mxu0 }
  0xb9   :  { %v537_v10 = vpop.f32.mrf.mxu1  ;;  %v563_v11 = vpop.f32.mrf.mxu3  ;;  %v550_v12 = vadd.f32 %v549_v6, %v536_v7  ;;  %v524_v13 = vadd.f32 %v523_v9, %v223_v8  ;;  %v2724_v7 = vld [vmem:[%s3720_s27] ss:$0 sm:$0xff] }
  0xbb   :  { %v564_v14 = vadd.f32 %v563_v11, %v550_v12  ;;  %v538_v15 = vadd.f32 %v537_v10, %v524_v13  ;;  %v2727_v12 = vld [vmem:[%s3721_s29] ss:$0 sm:$0xff] }
  0xc0   :  { %v551_v16 = vpop.f32.mrf.mxu2 }
  0xc1   :  { %v552_v20 = vadd.f32 %v551_v16, %v538_v15  ;;  %v565_v22 = vpop.f32.mrf.mxu3  ;;  %v3171_v15 = vld [vmem:[%s3722_s1 + $0x30] sm:$0xff]  ;;  %v3176_v16 = vld [vmem:[%s3722_s1 + $0x20] sm:$0xff] }
  0xc3   :  { %v566_v23 = vadd.f32 %v565_v22, %v552_v20  ;;  %v3191_v20 = vld [vmem:[%s3722_s1 + $0x28] sm:$0xff]  ;;  %v3196_v22 = vld [vmem:[%s3722_s1 + $0x18] sm:$0xff] }
  0xd0   :  { %v577_v17 = vpop.f32.mrf.mxu0 }
  0xd1   :  { %v591_v18 = vpop.f32.mrf.mxu1  ;;  %v578_v19 = vadd.f32 %v577_v17, %v564_v14  ;;  %v3181_v17 = vld [vmem:[%s3722_s1 + $0x10] sm:$0xff] }
  0xd3   :  { %v3119_v21 = vadd.f32 %v591_v18, %v578_v19  ;;  %v3186_v19 = vld [vmem:[%s3722_s1 + $0x38] sm:$0xff] }
  0xd5   :  { %598 = vadd.xlane.f32.xlu0 %v3119_v21 }
  0xd8   :  { %v579_v24 = vpop.f32.mrf.mxu0 }
  0xd9   :  { %v580_v25 = vadd.f32 %v579_v24, %v566_v23  ;;  %v593_v26 = vpop.f32.mrf.mxu1  ;;  %v3201_v24 = vld [vmem:[%s3722_s1] sm:$0xff] }
  0xdb   :  { %v3122_v27 = vadd.f32 %v593_v26, %v580_v25  ;;  %v3206_v25 = vld [vmem:[%s3722_s1 + $0x8] sm:$0xff] }
  0xdd   :  { %600 = vadd.xlane.f32.xlu0 %v3122_v27 }
 0x148   :  { %v599_v28 = vpop.xlane.xlu0 %598 }
 0x149   :  { %v602_v29 = vmul.f32 0.03125, %v599_v28 }
 0x14b   :  { %v604_v31 = vsub.f32 %v3119_v21, %v602_v29 }
 0x14d   :  { %v609_v32 = vmul.f32 %v3128_v30, %v604_v31 }
 0x14f   :  { %v611_v33 = vmul.f32 %v609_v32, %v609_v32 }
 0x150   :  { %v601_v34 = vpop.xlane.xlu0 %600 }
 0x151   :  { %v603_v35 = vmul.f32 0.03125, %v601_v34  ;;  %613 = vadd.xlane.f32.xlu1 %v611_v33 }
 0x153   :  { %v605_v36 = vsub.f32 %v3122_v27, %v603_v35 }
 0x155   :  { %v610_v37 = vmul.f32 %v3128_v30, %v605_v36 }
 0x157   :  { %v612_v38 = vmul.f32 %v610_v37, %v610_v37 }
 0x159   :  { %615 = vadd.xlane.f32.xlu1 %v612_v38 }
 0x1c4   :  { %v614_v46 = vpop.xlane.xlu1 %613 }
 0x1c5   :  { %v617_v48 = vmul.f32 0.03125, %v614_v46 }
 0x1c7   :  { %v619_v49 = vadd.f32 1e-06, %v617_v48  ;;  %v3232_v48 = vld [vmem:[%s3724_s2 + $0x28] sm:$0xff] }
 0x1c9   :  { %2744 = vrsqrt.f32 %v619_v49  ;;  %vm627_vm1 = vweird.f32 %v619_v49 }
 0x1cc   :  { %v616_v50 = vpop.xlane.xlu1 %615 }
 0x1cd   :  { %v618_v51 = vmul.f32 0.03125, %v616_v50 }
 0x1cf   :  { %v2745_v52 = vpop.eup %2744  ;;  %v620_v53 = vadd.f32 1e-06, %v618_v51 }
 0x1d0   :  { %v622_v54 = vmul.f32 %v2745_v52, %v619_v49  ;;  %vm628_vm0 = vweird.f32 %v2745_v52  ;;  %v3237_v49 = vld [vmem:[%s3724_s2 + $0x20] sm:$0xff] }
 0x1d1   :  { %2746 = vrsqrt.f32 %v620_v53  ;;  %vm629_vm2 = vmor %vm627_vm1, %vm628_vm0  ;;  %vm637_vm4 = vweird.f32 %v620_v53 }
 0x1d2   :  { %v623_v55 = vmul.f32 %v2745_v52, %v622_v54  ;;  %v3249_v54 = vld [vmem:[%s3724_s2 + $0x10] sm:$0xff] }
 0x1d4   :  { %v624_v56 = vmul.f32 0.5, %v623_v55 }
 0x1d6   :  { %v625_v57 = vsub.f32 1.5, %v624_v56 }
 0x1d7   :  { %v2747_v58 = vpop.eup %2746 }
 0x1d8   :  { %v626_v59 = vmul.f32 %v2745_v52, %v625_v57  ;;  %v632_v60 = vmul.f32 %v2747_v58, %v620_v53  ;;  %vm638_vm3 = vweird.f32 %v2747_v58  ;;  %v3244_v53 = vld [vmem:[%s3724_s2 + $0x18] sm:$0xff] }
 0x1d9   :  { %vm639_vm5 = vmor %vm637_vm4, %vm638_vm3 }
 0x1da   :  { %v633_v61 = vmul.f32 %v2747_v58, %v632_v60  ;;  %v630_v62 = vsel %vm629_vm2, %v2745_v52, %v626_v59  ;;  %v3261_v59 = vld [vmem:[%s3724_s2] sm:$0xff] }
 0x1db   :  { %v641_v1 = vmul.f32 %v630_v62, %v609_v32 }
 0x1dc   :  { %v634_v63 = vmul.f32 0.5, %v633_v61 }
 0x1dd   :  { %v646_v6 = vmul.f32 %v2723_v2, %v641_v1 }
 0x1de   :  { %v635_v0 = vsub.f32 1.5, %v634_v63 }
 0x1df   :  { %v651_v9 = vadd.f32 %v2724_v7, %v646_v6 }
 0x1e0   :  { %v636_v3 = vmul.f32 %v2747_v58, %v635_v0  ;;  %v3268_v0 = vld [vmem:[%s3725_s6] sm:$0xff] }
 0x1e2   :  { %v640_v4 = vsel %vm639_vm5, %v2747_v58, %v636_v3  ;;  %v3256_v58 = vld [vmem:[%s3724_s2 + $0x8] sm:$0xff] }
 0x1e3   :  { %v642_v5 = vmul.f32 %v640_v4, %v610_v37 }
 0x1e5   :  { %v647_v8 = vmul.f32 %v2723_v2, %v642_v5  ;;  %v3275_v5 = vld [vmem:[%s3725_s6 + $0x8] sm:$0xff] }
 0x1e7   :  { %v652_v10 = vadd.f32 %v2724_v7, %v647_v8 }
 0x1e9   :  { %v653_v11 = vpack.c.bf16 %v652_v10, %v651_v9  ;;  %v3281_v9 = vpack.c.bf16 %v3186_v19, %v3171_v15  ;;  %v3286_v10 = vpack.c.bf16 %v3191_v20, %v3176_v16 }
 0x1eb   :  { %730 = vmatmul.bf16.vlgmr.msrb.gmra.mxu2 %v653_v11  ;;  %803 = vmatpush.bf16.msra.mxu0 %v3281_v9  ;;  %v3291_v11 = vpack.c.bf16 %v3196_v22, %v3181_v17 }
 0x1ef   :  { %804 = vmatpush.bf16.msra.mxu0 %v3286_v10 }
 0x1f3   :  { %805 = vmatpush.bf16.msra.mxu0 %v3291_v11 }
 0x26e   :  { %v731_v13 = vpop.f32.mrf.mxu2 }
 0x26f   :  { %v732_v14 = vadd.f32 %v2727_v12, %v731_v13  ;;  %v2656_v13 = vld [vmem:[%s3673_s12 + $0x38] sm:$0xff] }
 0x270   :  { %900 = vmatpush.bf16.msra.mxu2 %v2656_v13 }
 0x271   :  { %736 = vrot.lane.b32.xlu2 %v732_v14, %s3699_s3  ;;  %v754_v26 = vmul.f32 %v732_v14, %v3171_v15  ;;  %v752_v28 = vmul.f32 %v732_v14, %v3176_v16  ;;  %v750_v29 = vmul.f32 %v732_v14, %v3181_v17  ;;  %s3723_s3 = smov 64   ;;  %v748_v35 = vmul.f32 %v732_v14, %v3201_v24 }
 0x276   :  { %v733_v18 = vpop.f32.mrf.mxu2 }
 0x277   :  { %v734_v23 = vadd.f32 %v2727_v12, %v733_v18  ;;  %v3296_v12 = vpack.c.bf16 %v3206_v25, %v3201_v24  ;;  %v2654_v18 = vld [vmem:[%s3673_s12 + $0x28] sm:$0xff] }
 0x279   :  { %738 = vrot.lane.b32.xlu2 %v734_v23, %s3723_s3  ;;  %v755_v31 = vmul.f32 %v734_v23, %v3186_v19  ;;  %v753_v32 = vmul.f32 %v734_v23, %v3191_v20  ;;  %v756_v33 = vpack.c.bf16 %v734_v23, %v732_v14  ;;  %v751_v34 = vmul.f32 %v734_v23, %v3196_v22  ;;  %v2655_v14 = vld [vmem:[%s3673_s12 + $0x30] sm:$0xff] }
 0x27a   :  { %v749_v36 = vmul.f32 %v734_v23, %v3206_v25  ;;  %806 = vmatpush.bf16.msra.mxu0 %v3296_v12  ;;  %901 = vmatpush.bf16.msra.mxu2 %v2655_v14 }
 0x27b   :  { %v816_v37 = vpack.c.bf16 %v755_v31, %v754_v26  ;;  %v815_v38 = vpack.c.bf16 %v753_v32, %v752_v28  ;;  %v814_v39 = vpack.c.bf16 %v751_v34, %v750_v29 }
 0x27c   :  { %v813_v40 = vpack.c.bf16 %v749_v36, %v748_v35  ;;  %v2653_v36 = vld [vmem:[%s3673_s12 + $0x20] sm:$0xff] }
 0x27e   :  { %902 = vmatpush.bf16.msra.mxu2 %v2654_v18 }
 0x282   :  { %903 = vmatpush.bf16.msra.mxu2 %v2653_v36 }
 0x2cb   :  { %v737_v41 = vpop.permute.xlu2 %736 }
 0x2cc   :  { %v746_v45 = vmul.f32 %v737_v41, %v3220_v42  ;;  %v744_v51 = vmul.f32 %v737_v41, %v3237_v49  ;;  %v742_v56 = vmul.f32 %v737_v41, %v3249_v54  ;;  %v740_v61 = vmul.f32 %v737_v41, %v3261_v59 }
 0x2d3   :  { %v739_v44 = vpop.permute.xlu2 %738 }
 0x2d4   :  { %v747_v46 = vmul.f32 %v739_v44, %v3225_v43  ;;  %v745_v50 = vmul.f32 %v739_v44, %v3232_v48  ;;  %v743_v55 = vmul.f32 %v739_v44, %v3244_v53  ;;  %v741_v60 = vmul.f32 %v739_v44, %v3256_v58  ;;  %v3328_v44 = vld [vmem:[%s3672_s5] ss:$0 sm:$0xff] }
 0x2d6   :  { %v760_v47 = vpack.c.bf16 %v747_v46, %v746_v45  ;;  %v759_v52 = vpack.c.bf16 %v745_v50, %v744_v51  ;;  %v758_v57 = vpack.c.bf16 %v743_v55, %v742_v56  ;;  %v757_v62 = vpack.c.bf16 %v741_v60, %v740_v61  ;;  %v2729_v61 = vld [vmem:[%s3674_s13] ss:$0 sm:$0xff] }
 0x2d8   :  { %765 = vmatpush.bf16.xpose.msrb.mxu3 %v760_v47 }
 0x2e0   :  { %766 = vmatpush.bf16.xpose.msrb.mxu3 %v759_v52 }
 0x2e8   :  { %767 = vmatpush.bf16.xpose.msrb.mxu3 %v758_v57 }
 0x2f0   :  { %768 = vmatpush.bf16.xpose.msrb.mxu3 %v757_v62 }
 0x2f7   :  { %769 = vmatmul.bf16.vlgmr.msrb.gmra.mxu3 %v756_v33 }
 0x2f8   :  { %821 = vmatpush.bf16.msra.mxu3 %v816_v37  ;;  %v2652_v37 = vld [vmem:[%s3673_s12 + $0x18] sm:$0xff] }
 0x2f9   :  { %904 = vmatpush.bf16.msra.mxu2 %v2652_v37 }
 0x2fc   :  { %822 = vmatpush.bf16.msra.mxu3 %v815_v38  ;;  %v2651_v38 = vld [vmem:[%s3673_s12 + $0x10] sm:$0xff] }
 0x2fd   :  { %905 = vmatpush.bf16.msra.mxu2 %v2651_v38  ;;  %v2657_v38 = vld [vmem:[%s3678_s16] sm:$0xff] }
 0x300   :  { %823 = vmatpush.bf16.msra.mxu3 %v814_v39  ;;  %v2650_v39 = vld [vmem:[%s3673_s12 + $0x8] sm:$0xff] }
 0x301   :  { %906 = vmatpush.bf16.msra.mxu2 %v2650_v39 }
 0x304   :  { %824 = vmatpush.bf16.msra.mxu3 %v813_v40  ;;  %v2649_v40 = vld [vmem:[%s3673_s12] sm:$0xff] }
 0x305   :  { %907 = vmatpush.bf16.msra.mxu2 %v2649_v40 }
 0x37a   :  { %v770_v63 = vpop.f32.mrf.mxu3 }
 0x37b   :  { %v775_v1 = vmul.f32 0.35355338, %v770_v63 }
 0x37d   :  { %v777_v2 = vadd.f32 %v775_v1, %v3268_v0 }
 0x37f   :  { %v780_v3 = vsel %vm779_vm6, %v777_v2, -inf }
 0x380   :  { %781 = vmax.xlane.f32.xlu0 %v780_v3 }
 0x382   :  { %v772_v4 = vpop.f32.mrf.mxu3 }
 0x383   :  { %v776_v6 = vmul.f32 0.35355338, %v772_v4 }
 0x385   :  { %v778_v7 = vadd.f32 %v776_v6, %v3275_v5 }
 0x387   :  { %v783_v8 = vsel %vm779_vm6, %v778_v7, -inf }
 0x388   :  { %784 = vmax.xlane.f32.xlu1 %v783_v8 }
 0x3f3   :  { %v782_v23 = vpop.xlane.xlu0 %781 }
 0x3f4   :  { %v786_v26 = vsub.f32 %v777_v2, %v782_v23 }
 0x3f6   :  { %v788_v28 = vmul.f32 1.442695, %v786_v26 }
 0x3f8   :  { %2748 = vpow2.f32 %v788_v28 }
 0x3fb   :  { %v785_v29 = vpop.xlane.xlu1 %784 }
 0x3fc   :  { %v787_v31 = vsub.f32 %v778_v7, %v785_v29  ;;  %v2663_v29 = vld [vmem:[%s3678_s16 + $0x30] sm:$0xff] }
 0x3fe   :  { %v790_v32 = vmul.f32 1.442695, %v787_v31  ;;  %v2749_v33 = vpop.eup %2748  ;;  %v2662_v31 = vld [vmem:[%s3678_s16 + $0x28] sm:$0xff] }
 0x400   :  { %2750 = vpow2.f32 %v790_v32  ;;  %v2661_v32 = vld [vmem:[%s3678_s16 + $0x20] sm:$0xff] }
 0x406   :  { %v2751_v34 = vpop.eup %2750 }
 0x407   :  { %v792_v35 = vpack.c.bf16 %v2751_v34, %v2749_v33  ;;  %v2660_v33 = vld [vmem:[%s3678_s16 + $0x18] sm:$0xff]  ;;  %v2659_v34 = vld [vmem:[%s3678_s16 + $0x10] sm:$0xff] }
 0x409   :  { %2227 = vmatmul.msk.bf16.vlgmr.msra.gmra.mxu0 %vm779_vm6, %v792_v35  ;;  %2228 = vmatmul.msk.bf16.vlgmr.msra.gmra.mxu3 %vm779_vm6, %v792_v35  ;;  %v2658_v35 = vld [vmem:[%s3678_s16 + $0x8] sm:$0xff] }
 0x486   :  { %v808_v41 = vpop.f32.mrf.mxu0 }
 0x487   :  { %v809_v45 = vadd.f32 %v3328_v44, %v808_v41 }
 0x489   :  { %2752 = vrcp.f32 %v809_v45 }
 0x48c   :  { %v826_v46 = vpop.f32.mrf.mxu3 }
 0x48e   :  { %v810_v47 = vpop.f32.mrf.mxu0 }
 0x48f   :  { %v811_v50 = vadd.f32 %v3328_v44, %v810_v47  ;;  %v2753_v51 = vpop.eup %2752 }
 0x490   :  { %v833_v56 = vmul.f32 %v2753_v51, %v826_v46 }
 0x491   :  { %2754 = vrcp.f32 %v811_v50 }
 0x494   :  { %v828_v55 = vpop.f32.mrf.mxu3 }
 0x497   :  { %v2755_v52 = vpop.eup %2754 }
 0x498   :  { %v834_v57 = vmul.f32 %v2755_v52, %v828_v55 }
 0x49a   :  { %v835_v60 = vpack.c.bf16 %v834_v57, %v833_v56 }
 0x49c   :  { %908 = vmatmul.bf16.vlgmr.msra.gmra.mxu2 %v835_v60 }
 0x51f   :  { %v909_v62 = vpop.f32.mrf.mxu2 }
 0x520   :  { %v914_v63 = vadd.f32 %v909_v62, %v3119_v21 }
 0x522   :  { %v3336_v1 = vadd.f32 %v2729_v61, %v914_v63 }
 0x524   :  { %924 = vadd.xlane.f32.xlu2 %v3336_v1 }
 0x527   :  { %v911_v2 = vpop.f32.mrf.mxu2 }
 0x528   :  { %v915_v3 = vadd.f32 %v911_v2, %v3122_v27  ;;  %v2664_v27 = vld [vmem:[%s3678_s16 + $0x38] sm:$0xff] }
 0x529   :  { %1045 = vmatpush.bf16.msrb.mxu3 %v2664_v27  ;;  %v2667_v27 = vld [vmem:[%s3680_s18 + $0x10] sm:$0xff] }
 0x52a   :  { %v3340_v4 = vadd.f32 %v2729_v61, %v915_v3 }
 0x52c   :  { %926 = vadd.xlane.f32.xlu0 %v3340_v4 }
 0x52d   :  { %1046 = vmatpush.bf16.msrb.mxu3 %v2663_v29  ;;  %v2666_v29 = vld [vmem:[%s3680_s18 + $0x8] sm:$0xff] }
 0x531   :  { %1047 = vmatpush.bf16.msrb.mxu3 %v2662_v31  ;;  %v2732_v31 = vld [vmem:[%s3677_s17] ss:$0 sm:$0xff] }
 0x535   :  { %1048 = vmatpush.bf16.msrb.mxu3 %v2661_v32 }
 0x539   :  { %1049 = vmatpush.bf16.msrb.mxu3 %v2660_v33  ;;  %v2665_v33 = vld [vmem:[%s3680_s18] sm:$0xff] }
 0x53d   :  { %1050 = vmatpush.bf16.msrb.mxu3 %v2659_v34 }
 0x541   :  { %1051 = vmatpush.bf16.msrb.mxu3 %v2658_v35 }
 0x545   :  { %1052 = vmatpush.bf16.msrb.mxu3 %v2657_v38 }
 0x549   :  { %1368 = vmatpush.bf16.msra.mxu3 %v3281_v9 }
 0x54d   :  { %1369 = vmatpush.bf16.msra.mxu3 %v3286_v10 }
 0x551   :  { %1370 = vmatpush.bf16.msra.mxu3 %v3291_v11  ;;  %v2730_v11 = vld [vmem:[%s3675_s14] ss:$0 sm:$0xff] }
 0x555   :  { %1371 = vmatpush.bf16.msra.mxu3 %v3296_v12 }
 0x597   :  { %v925_v6 = vpop.xlane.xlu2 %924 }
 0x598   :  { %v928_v7 = vmul.f32 0.03125, %v925_v6  ;;  %v2731_v6 = vld [vmem:[%s3676_s15] ss:$0 sm:$0xff] }
 0x59a   :  { %v930_v8 = vsub.f32 %v3336_v1, %v928_v7 }
 0x59c   :  { %v932_v13 = vmul.f32 %v3128_v30, %v930_v8 }
 0x59e   :  { %v934_v14 = vmul.f32 %v932_v13, %v932_v13 }
 0x59f   :  { %v927_v18 = vpop.xlane.xlu0 %926 }
 0x5a0   :  { %v929_v21 = vmul.f32 0.03125, %v927_v18  ;;  %936 = vadd.xlane.f32.xlu1 %v934_v14 }
 0x5a2   :  { %v931_v23 = vsub.f32 %v3340_v4, %v929_v21  ;;  %v2671_v21 = vld [vmem:[%s3680_s18 + $0x30] sm:$0xff] }
 0x5a4   :  { %v933_v26 = vmul.f32 %v3128_v30, %v931_v23  ;;  %v2670_v23 = vld [vmem:[%s3680_s18 + $0x28] sm:$0xff] }
 0x5a6   :  { %v935_v28 = vmul.f32 %v933_v26, %v933_v26 }
 0x5a8   :  { %938 = vadd.xlane.f32.xlu0 %v935_v28  ;;  %v2668_v28 = vld [vmem:[%s3680_s18 + $0x18] sm:$0xff] }
 0x613   :  { %v937_v36 = vpop.xlane.xlu1 %936 }
 0x614   :  { %v940_v37 = vmul.f32 0.03125, %v937_v36 }
 0x616   :  { %v942_v39 = vadd.f32 1e-06, %v940_v37 }
 0x618   :  { %2756 = vrsqrt.f32 %v942_v39  ;;  %vm950_vm8 = vweird.f32 %v942_v39 }
 0x61b   :  { %v939_v40 = vpop.xlane.xlu0 %938 }
 0x61c   :  { %v941_v41 = vmul.f32 0.03125, %v939_v40 }
 0x61e   :  { %v2757_v45 = vpop.eup %2756  ;;  %v943_v46 = vadd.f32 1e-06, %v941_v41 }
 0x61f   :  { %v945_v47 = vmul.f32 %v2757_v45, %v942_v39  ;;  %vm951_vm7 = vweird.f32 %v2757_v45 }
 0x620   :  { %2758 = vrsqrt.f32 %v943_v46  ;;  %vm952_vm9 = vmor %vm950_vm8, %vm951_vm7  ;;  %vm960_vm11 = vweird.f32 %v943_v46 }
 0x621   :  { %v946_v50 = vmul.f32 %v2757_v45, %v945_v47 }
 0x623   :  { %v947_v51 = vmul.f32 0.5, %v946_v50 }
 0x625   :  { %v948_v52 = vsub.f32 1.5, %v947_v51 }
 0x626   :  { %v2759_v55 = vpop.eup %2758 }
 0x627   :  { %v949_v56 = vmul.f32 %v2757_v45, %v948_v52  ;;  %v955_v57 = vmul.f32 %v2759_v55, %v943_v46  ;;  %vm961_vm10 = vweird.f32 %v2759_v55 }
 0x628   :  { %vm962_vm12 = vmor %vm960_vm11, %vm961_vm10 }
 0x629   :  { %v956_v9 = vmul.f32 %v2759_v55, %v955_v57  ;;  %v953_v60 = vsel %vm952_vm9, %v2757_v45, %v949_v56 }
 0x62a   :  { %v964_v62 = vmul.f32 %v953_v60, %v932_v13  ;;  %v2672_v13 = vld [vmem:[%s3680_s18 + $0x38] sm:$0xff] }
 0x62b   :  { %v957_v10 = vmul.f32 0.5, %v956_v9  ;;  %1142 = vmatpush.bf16.msrb.mxu0 %v2672_v13 }
 0x62c   :  { %v969_v3 = vmul.f32 %v2730_v11, %v964_v62 }
 0x62d   :  { %v958_v61 = vsub.f32 1.5, %v957_v10 }
 0x62e   :  { %v974_v8 = vadd.f32 %v2731_v6, %v969_v3 }
 0x62f   :  { %v959_v63 = vmul.f32 %v2759_v55, %v958_v61  ;;  %1143 = vmatpush.bf16.msrb.mxu0 %v2671_v21 }
 0x631   :  { %v963_v12 = vsel %vm962_vm12, %v2759_v55, %v959_v63 }
 0x632   :  { %v965_v2 = vmul.f32 %v963_v12, %v933_v26  ;;  %v2669_v26 = vld [vmem:[%s3680_s18 + $0x20] sm:$0xff] }
 0x633   :  { %1144 = vmatpush.bf16.msrb.mxu0 %v2670_v23 }
 0x634   :  { %v970_v7 = vmul.f32 %v2730_v11, %v965_v2  ;;  %v2733_v11 = vld [vmem:[%s3679_s19] ss:$0 sm:$0xff] }
 0x636   :  { %v975_v14 = vadd.f32 %v2731_v6, %v970_v7 }
 0x637   :  { %1145 = vmatpush.bf16.msrb.mxu0 %v2669_v26 }
 0x638   :  { %v976_v18 = vpack.c.bf16 %v975_v14, %v974_v8 }
 0x63a   :  { %1053 = vmatmul.bf16.vlgmr.msrb.gmra.mxu3 %v976_v18 }
 0x63b   :  { %1146 = vmatpush.bf16.msrb.mxu0 %v2668_v28 }
 0x63f   :  { %1147 = vmatpush.bf16.msrb.mxu0 %v2667_v27 }
 0x643   :  { %1148 = vmatpush.bf16.msrb.mxu0 %v2666_v29  ;;  %v2679_v29 = vld [vmem:[%s3718_s30 + $0x70] sm:$0xff] }
 0x647   :  { %1149 = vmatpush.bf16.msrb.mxu0 %v2665_v33  ;;  %v2675_v33 = vld [vmem:[%s3718_s30 + $0x50] sm:$0xff] }
 0x6bd   :  { %v1054_v32 = vpop.f32.mrf.mxu3 }
 0x6be   :  { %v1055_v34 = vadd.f32 %v2732_v31, %v1054_v32  ;;  %v2676_v32 = vld [vmem:[%s3718_s30 + $0x58] sm:$0xff] }
 0x6c0   :  { %v1059_v35 = vmul.f32 %v1055_v34, %v1055_v34 }
 0x6c2   :  { %v1061_v36 = vmul.f32 %v1059_v35, %v1055_v34 }
 0x6c4   :  { %v1063_v37 = vmul.f32 0.044715, %v1061_v36 }
 0x6c5   :  { %v1056_v38 = vpop.f32.mrf.mxu3 }
 0x6c6   :  { %v1065_v39 = vadd.f32 %v1063_v37, %v1055_v34  ;;  %v1057_v40 = vadd.f32 %v2732_v31, %v1056_v38  ;;  %v2678_v31 = vld [vmem:[%s3718_s30 + $0x68] sm:$0xff]  ;;  %v2673_v37 = vld [vmem:[%s3718_s30 + $0x40] sm:$0xff] }
 0x6c8   :  { %v1067_v41 = vmul.f32 0.7978846, %v1065_v39  ;;  %v1060_v45 = vmul.f32 %v1057_v40, %v1057_v40 }
 0x6ca   :  { %v1062_v46 = vmul.f32 %v1060_v45, %v1057_v40  ;;  %2760 = vtanh.f32 %v1067_v41 }
 0x6cc   :  { %v1064_v47 = vmul.f32 0.044715, %v1062_v46 }
 0x6ce   :  { %v1066_v50 = vadd.f32 %v1064_v47, %v1057_v40 }
 0x6d0   :  { %v1068_v51 = vmul.f32 0.7978846, %v1066_v50  ;;  %v2761_v52 = vpop.eup %2760 }
 0x6d1   :  { %v1071_v55 = vadd.f32 1.0, %v2761_v52 }
 0x6d2   :  { %2762 = vtanh.f32 %v1068_v51 }
 0x6d3   :  { %v1073_v57 = vmul.f32 0.5, %v1071_v55 }
 0x6d5   :  { %v1075_v10 = vmul.f32 %v1073_v57, %v1055_v34  ;;  %v2674_v34 = vld [vmem:[%s3718_s30 + $0x48] sm:$0xff] }
 0x6d8   :  { %v2763_v56 = vpop.eup %2762 }
 0x6d9   :  { %v1072_v9 = vadd.f32 1.0, %v2763_v56 }
 0x6db   :  { %v1074_v60 = vmul.f32 0.5, %v1072_v9 }
 0x6dd   :  { %v1076_v61 = vmul.f32 %v1074_v60, %v1057_v40 }
 0x6df   :  { %v1077_v62 = vpack.c.bf16 %v1076_v61, %v1075_v10  ;;  %v2725_v61 = vld [vmem:[%s3719_s11 + $0x1] ss:$0 sm:$0xff] }
 0x6e1   :  { %1150 = vmatmul.bf16.vlgmr.msrb.gmra.mxu0 %v1077_v62 }
 0x75e   :  { %v1151_v63 = vpop.f32.mrf.mxu0 }
 0x75f   :  { %v1156_v12 = vadd.f32 %v1151_v63, %v3336_v1 }
 0x761   :  { %v3412_v2 = vadd.f32 %v2733_v11, %v1156_v12  ;;  %v2726_v12 = vld [vmem:[%s3720_s27 + $0x1] ss:$0 sm:$0xff] }
 0x763   :  { %1168 = vadd.xlane.f32.xlu1 %v3412_v2 }
 0x766   :  { %v1153_v3 = vpop.f32.mrf.mxu0 }
 0x767   :  { %v1157_v6 = vadd.f32 %v1153_v3, %v3340_v4  ;;  %v2680_v4 = vld [vmem:[%s3718_s30 + $0x78] sm:$0xff] }
 0x768   :  { %1291 = vmatpush.bf16.msra.mxu1 %v2680_v4 }
 0x769   :  { %v3416_v7 = vadd.f32 %v2733_v11, %v1157_v6 }
 0x76b   :  { %1170 = vadd.xlane.f32.xlu0 %v3416_v7 }
 0x76c   :  { %1292 = vmatpush.bf16.msra.mxu1 %v2679_v29 }
 0x770   :  { %1293 = vmatpush.bf16.msra.mxu1 %v2678_v31 }
 0x7d6   :  { %v1169_v8 = vpop.xlane.xlu1 %1168 }
 0x7d7   :  { %v1172_v14 = vmul.f32 0.03125, %v1169_v8 }
 0x7d9   :  { %v1174_v18 = vsub.f32 %v3412_v2, %v1172_v14 }
 0x7db   :  { %v1176_v13 = vmul.f32 %v3128_v30, %v1174_v18 }
 0x7dd   :  { %v1178_v21 = vmul.f32 %v1176_v13, %v1176_v13 }
 0x7de   :  { %v1171_v23 = vpop.xlane.xlu0 %1170 }
 0x7df   :  { %v1173_v1 = vmul.f32 0.03125, %v1171_v23  ;;  %1180 = vadd.xlane.f32.xlu1 %v1178_v21  ;;  %v2734_v23 = vld [vmem:[%s3721_s29 + $0x1] ss:$0 sm:$0xff] }
 0x7e1   :  { %v1175_v26 = vsub.f32 %v3416_v7, %v1173_v1 }
 0x7e3   :  { %v1177_v28 = vmul.f32 %v3128_v30, %v1175_v26  ;;  %v2677_v30 = vld [vmem:[%s3718_s30 + $0x60] sm:$0xff] }
 0x7e4   :  { %1294 = vmatpush.bf16.msra.mxu1 %v2677_v30 }
 0x7e5   :  { %v1179_v27 = vmul.f32 %v1177_v28, %v1177_v28 }
 0x7e7   :  { %1182 = vadd.xlane.f32.xlu0 %v1179_v27 }
 0x7e8   :  { %1295 = vmatpush.bf16.msra.mxu1 %v2676_v32 }
 0x7ec   :  { %1296 = vmatpush.bf16.msra.mxu1 %v2675_v33 }
 0x7f0   :  { %1297 = vmatpush.bf16.msra.mxu1 %v2674_v34 }
 0x7f4   :  { %1298 = vmatpush.bf16.msra.mxu1 %v2673_v37 }
 0x852   :  { %v1181_v35 = vpop.xlane.xlu1 %1180 }
 0x853   :  { %v1184_v36 = vmul.f32 0.03125, %v1181_v35 }
 0x855   :  { %v1186_v38 = vadd.f32 1e-06, %v1184_v36 }
 0x857   :  { %2764 = vrsqrt.f32 %v1186_v38  ;;  %vm1194_vm14 = vweird.f32 %v1186_v38 }
 0x85a   :  { %v1183_v39 = vpop.xlane.xlu0 %1182 }
 0x85b   :  { %v1185_v40 = vmul.f32 0.03125, %v1183_v39 }
 0x85d   :  { %v2765_v41 = vpop.eup %2764  ;;  %v1187_v45 = vadd.f32 1e-06, %v1185_v40 }
 0x85e   :  { %v1189_v46 = vmul.f32 %v2765_v41, %v1186_v38  ;;  %vm1195_vm13 = vweird.f32 %v2765_v41 }
 0x85f   :  { %2766 = vrsqrt.f32 %v1187_v45  ;;  %vm1196_vm15 = vmor %vm1194_vm14, %vm1195_vm13  ;;  %vm1204_vm1 = vweird.f32 %v1187_v45 }
 0x860   :  { %v1190_v47 = vmul.f32 %v2765_v41, %v1189_v46 }
 0x862   :  { %v1191_v50 = vmul.f32 0.5, %v1190_v47 }
 0x864   :  { %v1192_v51 = vsub.f32 1.5, %v1191_v50 }
 0x865   :  { %v2767_v52 = vpop.eup %2766 }
 0x866   :  { %v1193_v55 = vmul.f32 %v2765_v41, %v1192_v51  ;;  %v1199_v56 = vmul.f32 %v2767_v52, %v1187_v45  ;;  %vm1205_vm0 = vweird.f32 %v2767_v52 }
 0x867   :  { %vm1206_vm2 = vmor %vm1204_vm1, %vm1205_vm0 }
 0x868   :  { %v1200_v57 = vmul.f32 %v2767_v52, %v1199_v56  ;;  %v1197_v9 = vsel %vm1196_vm15, %v2765_v41, %v1193_v55 }
 0x869   :  { %v1208_v62 = vmul.f32 %v1197_v9, %v1176_v13 }
 0x86a   :  { %v1201_v60 = vmul.f32 0.5, %v1200_v57 }
 0x86b   :  { %v1213_v6 = vmul.f32 %v2725_v61, %v1208_v62  ;;  %v2686_v62 = vld [vmem:[%s3673_s12 + $0x68] sm:$0xff] }
 0x86c   :  { %v1202_v10 = vsub.f32 1.5, %v1201_v60 }
 0x86d   :  { %v1218_v14 = vadd.f32 %v2726_v12, %v1213_v6  ;;  %v2681_v6 = vld [vmem:[%s3673_s12 + $0x40] sm:$0xff] }
 0x86e   :  { %v1203_v11 = vmul.f32 %v2767_v52, %v1202_v10 }
 0x870   :  { %v1207_v63 = vsel %vm1206_vm2, %v2767_v52, %v1203_v11  ;;  %v2685_v11 = vld [vmem:[%s3673_s12 + $0x60] sm:$0xff] }
 0x871   :  { %v1209_v3 = vmul.f32 %v1207_v63, %v1177_v28  ;;  %v2684_v63 = vld [vmem:[%s3673_s12 + $0x58] sm:$0xff] }
 0x873   :  { %v1214_v8 = vmul.f32 %v2725_v61, %v1209_v3  ;;  %v2682_v3 = vld [vmem:[%s3673_s12 + $0x48] sm:$0xff] }
 0x875   :  { %v1219_v18 = vadd.f32 %v2726_v12, %v1214_v8  ;;  %v2683_v12 = vld [vmem:[%s3673_s12 + $0x50] sm:$0xff] }
 0x877   :  { %v1220_v21 = vpack.c.bf16 %v1219_v18, %v1218_v14 }
 0x879   :  { %1299 = vmatmul.bf16.vlgmr.msra.gmra.mxu1 %v1220_v21 }
 0x8f6   :  { %v1300_v13 = vpop.f32.mrf.mxu1 }
 0x8f7   :  { %v1301_v1 = vadd.f32 %v2734_v23, %v1300_v13 }
 0x8f9   :  { %1305 = vrot.lane.b32.xlu1 %v1301_v1, %s3723_s3  ;;  %v1323_v28 = vmul.f32 %v1301_v1, %v3171_v15  ;;  %v1321_v32 = vmul.f32 %v1301_v1, %v3176_v16  ;;  %v1319_v35 = vmul.f32 %v1301_v1, %v3181_v17  ;;  %v1317_v15 = vmul.f32 %v1301_v1, %v3201_v24 }
 0x8fe   :  { %v1302_v26 = vpop.f32.mrf.mxu1 }
 0x8ff   :  { %v1303_v27 = vadd.f32 %v2734_v23, %v1302_v26 }
 0x901   :  { %1307 = vrot.lane.b32.xlu0 %v1303_v27, %s3723_s3  ;;  %v1324_v4 = vmul.f32 %v1303_v27, %v3186_v19  ;;  %v1325_v29 = vpack.c.bf16 %v1303_v27, %v1301_v1  ;;  %v1322_v30 = vmul.f32 %v1303_v27, %v3191_v20  ;;  %v1320_v34 = vmul.f32 %v1303_v27, %v3196_v22 }
 0x902   :  { %v1318_v37 = vmul.f32 %v1303_v27, %v3206_v25 }
 0x903   :  { %v1381_v31 = vpack.c.bf16 %v1324_v4, %v1323_v28  ;;  %v1380_v33 = vpack.c.bf16 %v1322_v30, %v1321_v32  ;;  %v1379_v36 = vpack.c.bf16 %v1320_v34, %v1319_v35 }
 0x904   :  { %v1378_v19 = vpack.c.bf16 %v1318_v37, %v1317_v15  ;;  %v3521_v15 = vld [vmem:[%s3717_s8] ss:$0 sm:$0xff] }
 0x905   :  { %1386 = vmatpush.bf16.msra.mxu0 %v1381_v31 }
 0x909   :  { %1387 = vmatpush.bf16.msra.mxu0 %v1380_v33 }
 0x90d   :  { %1388 = vmatpush.bf16.msra.mxu0 %v1379_v36 }
 0x911   :  { %1389 = vmatpush.bf16.msra.mxu0 %v1378_v19 }
 0x96b   :  { %v1306_v38 = vpop.permute.xlu1 %1305 }
 0x96c   :  { %v1315_v20 = vmul.f32 %v1306_v38, %v3220_v42  ;;  %v1313_v17 = vmul.f32 %v1306_v38, %v3237_v49  ;;  %v1311_v24 = vmul.f32 %v1306_v38, %v3249_v54  ;;  %v1309_v42 = vmul.f32 %v1306_v38, %v3261_v59 }
 0x973   :  { %v1308_v39 = vpop.permute.xlu0 %1307 }
 0x974   :  { %v1316_v16 = vmul.f32 %v1308_v39, %v3225_v43  ;;  %v1314_v22 = vmul.f32 %v1308_v39, %v3232_v48  ;;  %v1312_v25 = vmul.f32 %v1308_v39, %v3244_v53  ;;  %v1310_v46 = vmul.f32 %v1308_v39, %v3256_v58  ;;  %v2688_v58 = vld [vmem:[%s3673_s12 + $0x78] sm:$0xff] }
 0x975   :  { %1466 = vmatpush.bf16.msrb.mxu1 %v2688_v58 }
 0x976   :  { %v1329_v40 = vpack.c.bf16 %v1316_v16, %v1315_v20  ;;  %v1328_v41 = vpack.c.bf16 %v1314_v22, %v1313_v17  ;;  %v1327_v45 = vpack.c.bf16 %v1312_v25, %v1311_v24  ;;  %v1326_v47 = vpack.c.bf16 %v1310_v46, %v1309_v42  ;;  %v2695_v22 = vld [vmem:[%s3678_s16 + $0x70] sm:$0xff]  ;;  %v2694_v17 = vld [vmem:[%s3678_s16 + $0x68] sm:$0xff]  ;;  %v2692_v25 = vld [vmem:[%s3678_s16 + $0x58] sm:$0xff] }
 0x977   :  { %v2691_v24 = vld [vmem:[%s3678_s16 + $0x50] sm:$0xff] }
 0x978   :  { %1334 = vmatpush.bf16.xpose.msrb.mxu2 %v1329_v40  ;;  %v2696_v40 = vld [vmem:[%s3678_s16 + $0x78] sm:$0xff] }
 0x979   :  { %1616 = vmatpush.bf16.msrb.mxu3 %v2696_v40 }
 0x97d   :  { %1617 = vmatpush.bf16.msrb.mxu3 %v2695_v22 }
 0x980   :  { %1335 = vmatpush.bf16.xpose.msrb.mxu2 %v1328_v41  ;;  %v2693_v41 = vld [vmem:[%s3678_s16 + $0x60] sm:$0xff] }
 0x981   :  { %1618 = vmatpush.bf16.msrb.mxu3 %v2694_v17 }
 0x985   :  { %1619 = vmatpush.bf16.msrb.mxu3 %v2693_v41 }
 0x988   :  { %1336 = vmatpush.bf16.xpose.msrb.mxu2 %v1327_v45  ;;  %v2690_v45 = vld [vmem:[%s3678_s16 + $0x48] sm:$0xff] }
 0x989   :  { %1620 = vmatpush.bf16.msrb.mxu3 %v2692_v25 }
 0x98d   :  { %1621 = vmatpush.bf16.msrb.mxu3 %v2691_v24 }
 0x990   :  { %1337 = vmatpush.bf16.xpose.msrb.mxu2 %v1326_v47  ;;  %v2689_v47 = vld [vmem:[%s3678_s16 + $0x40] sm:$0xff] }
 0x991   :  { %1622 = vmatpush.bf16.msrb.mxu3 %v2690_v45 }
 0x995   :  { %1623 = vmatpush.bf16.msrb.mxu3 %v2689_v47 }
 0x997   :  { %1338 = vmatmul.bf16.vlgmr.msrb.gmra.mxu2 %v1325_v29  ;;  %v2735_v29 = vld [vmem:[%s3674_s13 + $0x1] ss:$0 sm:$0xff] }
 0xa1a   :  { %v1339_v43 = vpop.f32.mrf.mxu2 }
 0xa1b   :  { %v1344_v50 = vmul.f32 0.35355338, %v1339_v43 }
 0xa1d   :  { %v1346_v48 = vadd.f32 %v1344_v50, %v3268_v0 }
 0xa1f   :  { %v1348_v49 = vsel %vm779_vm6, %v1346_v48, -inf }
 0xa20   :  { %1349 = vmax.xlane.f32.xlu2 %v1348_v49 }
 0xa22   :  { %v1341_v51 = vpop.f32.mrf.mxu2 }
 0xa23   :  { %v1345_v53 = vmul.f32 0.35355338, %v1341_v51 }
 0xa25   :  { %v1347_v54 = vadd.f32 %v1345_v53, %v3275_v5  ;;  %v2687_v5 = vld [vmem:[%s3673_s12 + $0x70] sm:$0xff] }
 0xa26   :  { %1467 = vmatpush.bf16.msrb.mxu1 %v2687_v5 }
 0xa27   :  { %v1351_v52 = vsel %vm779_vm6, %v1347_v54, -inf }
 0xa28   :  { %1352 = vmax.xlane.f32.xlu2 %v1351_v52 }
 0xa2a   :  { %1468 = vmatpush.bf16.msrb.mxu1 %v2686_v62 }
 0xa2e   :  { %1469 = vmatpush.bf16.msrb.mxu1 %v2685_v11 }
 0xa32   :  { %1470 = vmatpush.bf16.msrb.mxu1 %v2684_v63 }
 0xa36   :  { %1471 = vmatpush.bf16.msrb.mxu1 %v2683_v12  ;;  %v2737_v12 = vld [vmem:[%s3676_s15 + $0x1] ss:$0 sm:$0xff] }
 0xa3a   :  { %1472 = vmatpush.bf16.msrb.mxu1 %v2682_v3 }
 0xa3e   :  { %1473 = vmatpush.bf16.msrb.mxu1 %v2681_v6 }
 0xa93   :  { %v1350_v59 = vpop.xlane.xlu2 %1349 }
 0xa94   :  { %v1354_v55 = vsub.f32 %v1346_v48, %v1350_v59 }
 0xa96   :  { %v1356_v56 = vmul.f32 1.442695, %v1354_v55 }
 0xa98   :  { %2768 = vpow2.f32 %v1356_v56 }
 0xa9b   :  { %v1353_v57 = vpop.xlane.xlu2 %1352 }
 0xa9c   :  { %v1355_v0 = vsub.f32 %v1347_v54, %v1353_v57 }
 0xa9e   :  { %v1358_v9 = vmul.f32 1.442695, %v1355_v0  ;;  %v2769_v60 = vpop.eup %2768 }
 0xaa0   :  { %2770 = vpow2.f32 %v1358_v9 }
 0xaa6   :  { %v2771_v10 = vpop.eup %2770 }
 0xaa7   :  { %v1360_v61 = vpack.c.bf16 %v2771_v10, %v2769_v60  ;;  %v2736_v10 = vld [vmem:[%s3675_s14 + $0x1] ss:$0 sm:$0xff] }
 0xaa9   :  { %2376 = vmatmul.msk.bf16.vlgmr.msra.gmra.mxu3 %vm779_vm6, %v1360_v61  ;;  %2377 = vmatmul.msk.bf16.vlgmr.msra.gmra.mxu0 %vm779_vm6, %v1360_v61 }
 0xb26   :  { %v1391_v18 = vpop.f32.mrf.mxu0 }
 0xb2c   :  { %v1373_v8 = vpop.f32.mrf.mxu3 }
 0xb2d   :  { %v1374_v14 = vadd.f32 %v3328_v44, %v1373_v8 }
 0xb2e   :  { %v1393_v26 = vpop.f32.mrf.mxu0 }
 0xb2f   :  { %2772 = vrcp.f32 %v1374_v14 }
 0xb34   :  { %v1375_v21 = vpop.f32.mrf.mxu3 }
 0xb35   :  { %v1376_v23 = vadd.f32 %v3328_v44, %v1375_v21  ;;  %v2773_v13 = vpop.eup %2772  ;;  %v2703_v21 = vld [vmem:[%s3680_s18 + $0x70] sm:$0xff] }
 0xb36   :  { %v1398_v27 = vmul.f32 %v2773_v13, %v1391_v18  ;;  %v2704_v18 = vld [vmem:[%s3680_s18 + $0x78] sm:$0xff]  ;;  %v2701_v13 = vld [vmem:[%s3680_s18 + $0x60] sm:$0xff] }
 0xb37   :  { %2774 = vrcp.f32 %v1376_v23  ;;  %1714 = vmatpush.bf16.msrb.mxu0 %v2704_v18  ;;  %v2702_v23 = vld [vmem:[%s3680_s18 + $0x68] sm:$0xff] }
 0xb3b   :  { %1715 = vmatpush.bf16.msrb.mxu0 %v2703_v21 }
 0xb3d   :  { %v2775_v1 = vpop.eup %2774 }
 0xb3e   :  { %v1399_v28 = vmul.f32 %v2775_v1, %v1393_v26  ;;  %v2700_v1 = vld [vmem:[%s3680_s18 + $0x58] sm:$0xff]  ;;  %v2699_v26 = vld [vmem:[%s3680_s18 + $0x50] sm:$0xff] }
 0xb3f   :  { %1716 = vmatpush.bf16.msrb.mxu0 %v2702_v23 }
 0xb40   :  { %v1400_v4 = vpack.c.bf16 %v1399_v28, %v1398_v27  ;;  %v2698_v27 = vld [vmem:[%s3680_s18 + $0x48] sm:$0xff]  ;;  %v2738_v28 = vld [vmem:[%s3677_s17 + $0x1] ss:$0 sm:$0xff] }
 0xb42   :  { %1474 = vmatmul.bf16.vlgmr.msrb.gmra.mxu1 %v1400_v4 }
 0xb43   :  { %1717 = vmatpush.bf16.msrb.mxu0 %v2701_v13  ;;  %v2718_v13 = vld [vmem:[%s3685_s24 + $0x28] sm:$0xff] }
 0xb47   :  { %1718 = vmatpush.bf16.msrb.mxu0 %v2700_v1 }
 0xb4b   :  { %1719 = vmatpush.bf16.msrb.mxu0 %v2699_v26 }
 0xb4f   :  { %1720 = vmatpush.bf16.msrb.mxu0 %v2698_v27  ;;  %v2717_v27 = vld [vmem:[%s3685_s24 + $0x20] sm:$0xff] }
 0xbbf   :  { %v1475_v31 = vpop.f32.mrf.mxu1 }
 0xbc0   :  { %v1480_v30 = vadd.f32 %v1475_v31, %v3412_v2 }
 0xbc2   :  { %v3510_v32 = vadd.f32 %v2735_v29, %v1480_v30 }
 0xbc4   :  { %1493 = vadd.xlane.f32.xlu1 %v3510_v32 }
 0xbc7   :  { %v1477_v44 = vpop.f32.mrf.mxu1 }
 0xbc8   :  { %v1481_v33 = vadd.f32 %v1477_v44, %v3416_v7 }
 0xbca   :  { %v3514_v34 = vadd.f32 %v2735_v29, %v1481_v33  ;;  %v2697_v29 = vld [vmem:[%s3680_s18 + $0x40] sm:$0xff] }
 0xbcb   :  { %1721 = vmatpush.bf16.msrb.mxu0 %v2697_v29 }
 0xbcc   :  { %1495 = vadd.xlane.f32.xlu2 %v3514_v34 }
 0xc37   :  { %v1494_v35 = vpop.xlane.xlu1 %1493 }
 0xc38   :  { %v1497_v36 = vmul.f32 0.03125, %v1494_v35 }
 0xc3a   :  { %v1499_v37 = vsub.f32 %v3510_v32, %v1497_v36 }
 0xc3c   :  { %v1501_v2 = vmul.f32 %v3521_v15, %v1499_v37 }
 0xc3e   :  { %v1503_v19 = vmul.f32 %v1501_v2, %v1501_v2 }
 0xc3f   :  { %v1496_v38 = vpop.xlane.xlu2 %1495 }
 0xc40   :  { %v1498_v39 = vmul.f32 0.03125, %v1496_v38  ;;  %1505 = vadd.xlane.f32.xlu0 %v1503_v19 }
 0xc42   :  { %v1500_v7 = vsub.f32 %v3514_v34, %v1498_v39 }
 0xc44   :  { %v1502_v20 = vmul.f32 %v3521_v15, %v1500_v7 }
 0xc46   :  { %v1504_v16 = vmul.f32 %v1502_v20, %v1502_v20 }
 0xc48   :  { %1507 = vadd.xlane.f32.xlu2 %v1504_v16 }
 0xcb3   :  { %v1506_v46 = vpop.xlane.xlu0 %1505 }
 0xcb4   :  { %v1509_v42 = vmul.f32 0.03125, %v1506_v46 }
 0xcb6   :  { %v1511_v43 = vadd.f32 1e-06, %v1509_v42  ;;  %v2739_v42 = vld [vmem:[%s3679_s19 + $0x1] ss:$0 sm:$0xff] }
 0xcb8   :  { %2776 = vrsqrt.f32 %v1511_v43  ;;  %vm1519_vm4 = vweird.f32 %v1511_v43 }
 0xcbb   :  { %v1508_v50 = vpop.xlane.xlu2 %1507 }
 0xcbc   :  { %v1510_v48 = vmul.f32 0.03125, %v1508_v50 }
 0xcbe   :  { %v2777_v49 = vpop.eup %2776  ;;  %v1512_v51 = vadd.f32 1e-06, %v1510_v48 }
 0xcbf   :  { %v1514_v53 = vmul.f32 %v2777_v49, %v1511_v43  ;;  %vm1520_vm3 = vweird.f32 %v2777_v49 }
 0xcc0   :  { %2778 = vrsqrt.f32 %v1512_v51  ;;  %vm1521_vm5 = vmor %vm1519_vm4, %vm1520_vm3  ;;  %vm1529_vm7 = vweird.f32 %v1512_v51 }
 0xcc1   :  { %v1515_v54 = vmul.f32 %v2777_v49, %v1514_v53 }
 0xcc3   :  { %v1516_v52 = vmul.f32 0.5, %v1515_v54 }
 0xcc5   :  { %v1517_v58 = vsub.f32 1.5, %v1516_v52 }
 0xcc6   :  { %v2779_v59 = vpop.eup %2778 }
 0xcc7   :  { %v1518_v55 = vmul.f32 %v2777_v49, %v1517_v58  ;;  %v1524_v56 = vmul.f32 %v2779_v59, %v1512_v51  ;;  %vm1530_vm6 = vweird.f32 %v2779_v59 }
 0xcc8   :  { %vm1531_vm8 = vmor %vm1529_vm7, %vm1530_vm6 }
 0xcc9   :  { %v1525_v57 = vmul.f32 %v2779_v59, %v1524_v56  ;;  %v1522_v0 = vsel %vm1521_vm5, %v2777_v49, %v1518_v55 }
 0xcca   :  { %v1533_v61 = vmul.f32 %v1522_v0, %v1501_v2 }
 0xccb   :  { %v1526_v9 = vmul.f32 0.5, %v1525_v57 }
 0xccc   :  { %v1538_v11 = vmul.f32 %v2736_v10, %v1533_v61  ;;  %v2707_v61 = vld [vmem:[%s3684_s22 + $0x10] sm:$0xff] }
 0xccd   :  { %v1527_v60 = vsub.f32 1.5, %v1526_v9  ;;  %v2711_v9 = vld [vmem:[%s3684_s22 + $0x30] sm:$0xff] }
 0xcce   :  { %v1543_v6 = vadd.f32 %v2737_v12, %v1538_v11 }
 0xccf   :  { %v1528_v5 = vmul.f32 %v2779_v59, %v1527_v60  ;;  %v2710_v60 = vld [vmem:[%s3684_s22 + $0x28] sm:$0xff] }
 0xcd1   :  { %v1532_v62 = vsel %vm1531_vm8, %v2779_v59, %v1528_v5  ;;  %v2706_v5 = vld [vmem:[%s3684_s22 + $0x8] sm:$0xff] }
 0xcd2   :  { %v1534_v63 = vmul.f32 %v1532_v62, %v1502_v20 }
 0xcd4   :  { %v1539_v3 = vmul.f32 %v2736_v10, %v1534_v63  ;;  %v2708_v10 = vld [vmem:[%s3684_s22 + $0x18] sm:$0xff]  ;;  %v2705_v63 = vld [vmem:[%s3684_s22] sm:$0xff] }
 0xcd6   :  { %v1544_v8 = vadd.f32 %v2737_v12, %v1539_v3  ;;  %v2720_v3 = vld [vmem:[%s3685_s24 + $0x38] sm:$0xff] }
 0xcd7   :  { %1945 = vmatpush.bf16.msra.mxu1 %v2720_v3 }
 0xcd8   :  { %v1545_v14 = vpack.c.bf16 %v1544_v8, %v1543_v6 }
 0xcda   :  { %1624 = vmatmul.bf16.vlgmr.msrb.gmra.mxu3 %v1545_v14  ;;  %v2719_v14 = vld [vmem:[%s3685_s24 + $0x30] sm:$0xff] }
 0xcdb   :  { %1946 = vmatpush.bf16.msra.mxu1 %v2719_v14 }
 0xcdf   :  { %1947 = vmatpush.bf16.msra.mxu1 %v2718_v13 }
 0xce3   :  { %1948 = vmatpush.bf16.msra.mxu1 %v2717_v27 }
 0xd5d   :  { %v1625_v4 = vpop.f32.mrf.mxu3 }
 0xd5e   :  { %v1626_v31 = vadd.f32 %v2738_v28, %v1625_v4 }
 0xd60   :  { %v1630_v30 = vmul.f32 %v1626_v31, %v1626_v31 }
 0xd62   :  { %v1632_v44 = vmul.f32 %v1630_v30, %v1626_v31 }
 0xd64   :  { %v1634_v33 = vmul.f32 0.044715, %v1632_v44 }
 0xd65   :  { %v1627_v35 = vpop.f32.mrf.mxu3 }
 0xd66   :  { %v1636_v36 = vadd.f32 %v1634_v33, %v1626_v31  ;;  %v1628_v37 = vadd.f32 %v2738_v28, %v1627_v35 }
 0xd68   :  { %v1638_v2 = vmul.f32 0.7978846, %v1636_v36  ;;  %v1631_v19 = vmul.f32 %v1628_v37, %v1628_v37 }
 0xd6a   :  { %v1633_v38 = vmul.f32 %v1631_v19, %v1628_v37  ;;  %2780 = vtanh.f32 %v1638_v2 }
 0xd6c   :  { %v1635_v39 = vmul.f32 0.044715, %v1633_v38 }
 0xd6e   :  { %v1637_v7 = vadd.f32 %v1635_v39, %v1628_v37 }
 0xd70   :  { %v1639_v20 = vmul.f32 0.7978846, %v1637_v7  ;;  %v2781_v16 = vpop.eup %2780  ;;  %v2741_v7 = vld [vmem:[%s3682_s21] ss:$0 sm:$0xff] }
 0xd71   :  { %v1642_v40 = vadd.f32 1.0, %v2781_v16 }
 0xd72   :  { %2782 = vtanh.f32 %v1639_v20 }
 0xd73   :  { %v1644_v17 = vmul.f32 0.5, %v1642_v40 }
 0xd75   :  { %v1646_v24 = vmul.f32 %v1644_v17, %v1626_v31  ;;  %v2716_v17 = vld [vmem:[%s3685_s24 + $0x18] sm:$0xff] }
 0xd76   :  { %1949 = vmatpush.bf16.msra.mxu1 %v2716_v17 }
 0xd78   :  { %v2783_v22 = vpop.eup %2782 }
 0xd79   :  { %v1643_v41 = vadd.f32 1.0, %v2783_v22 }
 0xd7b   :  { %v1645_v25 = vmul.f32 0.5, %v1643_v41  ;;  %v2715_v41 = vld [vmem:[%s3685_s24 + $0x10] sm:$0xff] }
 0xd7c   :  { %1950 = vmatpush.bf16.msra.mxu1 %v2715_v41 }
 0xd7d   :  { %v1647_v45 = vmul.f32 %v1645_v25, %v1628_v37  ;;  %v2740_v37 = vld [vmem:[%s3681_s20] ss:$0 sm:$0xff]  ;;  %v2714_v25 = vld [vmem:[%s3685_s24 + $0x8] sm:$0xff] }
 0xd7f   :  { %v1648_v46 = vpack.c.bf16 %v1647_v45, %v1646_v24  ;;  %v2713_v24 = vld [vmem:[%s3685_s24] sm:$0xff] }
 0xd80   :  { %1951 = vmatpush.bf16.msra.mxu1 %v2714_v25 }
 0xd81   :  { %1722 = vmatmul.bf16.vlgmr.msrb.gmra.mxu0 %v1648_v46  ;;  %v2742_v46 = vld [vmem:[%s3683_s23] ss:$0 sm:$0xff] }
 0xd84   :  { %1952 = vmatpush.bf16.msra.mxu1 %v2713_v24 }
 0xdfe   :  { %v1723_v47 = vpop.f32.mrf.mxu0 }
 0xdff   :  { %v1728_v43 = vadd.f32 %v1723_v47, %v3510_v32 }
 0xe01   :  { %v1735_v50 = vadd.f32 %v2739_v42, %v1728_v43 }
 0xe03   :  { %1739 = vadd.xlane.f32.xlu2 %v1735_v50 }
 0xe06   :  { %v1725_v48 = vpop.f32.mrf.mxu0 }
 0xe07   :  { %v1729_v49 = vadd.f32 %v1725_v48, %v3514_v34  ;;  %v2712_v34 = vld [vmem:[%s3684_s22 + $0x38] sm:$0xff] }
 0xe08   :  { %1860 = vmatpush.bf16.msra.mxu2 %v2712_v34 }
 0xe09   :  { %v1736_v51 = vadd.f32 %v2739_v42, %v1729_v49 }
 0xe0b   :  { %1741 = vadd.xlane.f32.xlu2 %v1736_v51 }
 0xe0c   :  { %1861 = vmatpush.bf16.msra.mxu2 %v2711_v9 }
 0xe10   :  { %1862 = vmatpush.bf16.msra.mxu2 %v2710_v60 }
 0xe76   :  { %v1740_v53 = vpop.xlane.xlu2 %1739 }
 0xe77   :  { %v1743_v54 = vmul.f32 0.03125, %v1740_v53 }
 0xe79   :  { %v1745_v52 = vsub.f32 %v1735_v50, %v1743_v54 }
 0xe7b   :  { %v1747_v58 = vmul.f32 %v3521_v15, %v1745_v52 }
 0xe7d   :  { %v1749_v59 = vmul.f32 %v1747_v58, %v1747_v58 }
 0xe7e   :  { %v1742_v55 = vpop.xlane.xlu2 %1741 }
 0xe7f   :  { %v1744_v56 = vmul.f32 0.03125, %v1742_v55  ;;  %1751 = vadd.xlane.f32.xlu2 %v1749_v59 }
 0xe81   :  { %v1746_v57 = vsub.f32 %v1736_v51, %v1744_v56  ;;  %v2743_v51 = vld [vmem:[%s3686_s25] ss:$0 sm:$0xff]  ;;  %s3726_s25 = sld [smem:[#allocation13_spill]] }
 0xe83   :  { %v3590_v0 = vmul.f32 %v3521_v15, %v1746_v57  ;;  %v2709_v15 = vld [vmem:[%s3684_s22 + $0x20] sm:$0xff] }
 0xe84   :  { %1863 = vmatpush.bf16.msra.mxu2 %v2709_v15 }
 0xe85   :  { %v1750_v32 = vmul.f32 %v3590_v0, %v3590_v0 }
 0xe87   :  { %1753 = vadd.xlane.f32.xlu2 %v1750_v32 }
 0xe88   :  { %1864 = vmatpush.bf16.msra.mxu2 %v2708_v10 }
 0xe8c   :  { %1865 = vmatpush.bf16.msra.mxu2 %v2707_v61 }
 0xe90   :  { %1866 = vmatpush.bf16.msra.mxu2 %v2706_v5 }
 0xe94   :  { %1867 = vmatpush.bf16.msra.mxu2 %v2705_v63 }
 0xef2   :  { %v1752_v62 = vpop.xlane.xlu2 %1751 }
 0xef3   :  { %v1755_v11 = vmul.f32 0.03125, %v1752_v62 }
 0xef5   :  { %v1757_v12 = vadd.f32 1e-06, %v1755_v11 }
 0xef7   :  { %2784 = vrsqrt.f32 %v1757_v12  ;;  %vm1765_vm10 = vweird.f32 %v1757_v12 }
 0xefa   :  { %v1754_v6 = vpop.xlane.xlu2 %1753 }
 0xefb   :  { %v1756_v8 = vmul.f32 0.03125, %v1754_v6 }
 0xefd   :  { %v2785_v18 = vpop.eup %2784  ;;  %v1758_v21 = vadd.f32 1e-06, %v1756_v8 }
 0xefe   :  { %v1760_v23 = vmul.f32 %v2785_v18, %v1757_v12  ;;  %vm1766_vm9 = vweird.f32 %v2785_v18 }
 0xeff   :  { %2786 = vrsqrt.f32 %v1758_v21  ;;  %vm1767_vm11 = vmor %vm1765_vm10, %vm1766_vm9  ;;  %vm1775_vm13 = vweird.f32 %v1758_v21 }
 0xf00   :  { %v1761_v1 = vmul.f32 %v2785_v18, %v1760_v23 }
 0xf02   :  { %v1762_v26 = vmul.f32 0.5, %v1761_v1 }
 0xf04   :  { %v1763_v28 = vsub.f32 1.5, %v1762_v26 }
 0xf05   :  { %v2787_v4 = vpop.eup %2786 }
 0xf06   :  { %v1764_v29 = vmul.f32 %v2785_v18, %v1763_v28  ;;  %v1770_v31 = vmul.f32 %v2787_v4, %v1758_v21  ;;  %vm1776_vm12 = vweird.f32 %v2787_v4 }
 0xf07   :  { %vm1777_vm14 = vmor %vm1775_vm13, %vm1776_vm12 }
 0xf08   :  { %v1771_v30 = vmul.f32 %v2787_v4, %v1770_v31  ;;  %v1768_v44 = vsel %vm1767_vm11, %v2785_v18, %v1764_v29 }
 0xf09   :  { %v1779_v36 = vmul.f32 %v1768_v44, %v1747_v58 }
 0xf0a   :  { %v1772_v33 = vmul.f32 0.5, %v1771_v30 }
 0xf0b   :  { %v1784_v39 = vmul.f32 %v2740_v37, %v1779_v36 }
 0xf0c   :  { %v1773_v35 = vsub.f32 1.5, %v1772_v33 }
 0xf0d   :  { %v1789_v16 = vadd.f32 %v2741_v7, %v1784_v39 }
 0xf0e   :  { %v1774_v2 = vmul.f32 %v2787_v4, %v1773_v35 }
 0xf10   :  { %v1778_v19 = vsel %vm1777_vm14, %v2787_v4, %v1774_v2 }
 0xf11   :  { %v1780_v38 = vmul.f32 %v1778_v19, %v3590_v0 }
 0xf13   :  { %v1785_v20 = vmul.f32 %v2740_v37, %v1780_v38 }
 0xf15   :  { %v1790_v40 = vadd.f32 %v2741_v7, %v1785_v20 }
 0xf17   :  { %v1791_v22 = vpack.c.bf16 %v1790_v40, %v1789_v16 }
 0xf19   :  { %1868 = vmatmul.bf16.vlgmr.msra.gmra.mxu2 %v1791_v22 }
 0xf9c   :  { %v1869_v45 = vpop.f32.mrf.mxu2 }
 0xf9d   :  { %v1870_v42 = vadd.f32 %v2742_v46, %v1869_v45 }
 0xf9f   :  { %v1874_v50 = vmax.f32 %v1870_v42, 0.0 }
 0xfa4   :  { %v1871_v47 = vpop.f32.mrf.mxu2 }
 0xfa5   :  { %v1872_v43 = vadd.f32 %v2742_v46, %v1871_v47 }
 0xfa7   :  { %v1875_v48 = vmax.f32 %v1872_v43, 0.0 }
 0xfa9   :  { %v1876_v49 = vpack.c.bf16 %v1875_v48, %v1874_v50 }
 0xfab   :  { %1953 = vmatmul.bf16.vlgmr.msra.gmra.mxu1 %v1876_v49 }
0x1028   :  { %v1954_v53 = vpop.f32.mrf.mxu1 }
0x1029   :  { %v1955_v54 = vadd.f32 %v2743_v51, %v1954_v53 }
0x102b   :  { %v2591_v52 = vmul.f32 -1.442695, %v1955_v54 }
0x102d   :  { %2788 = vpow2.f32 %v2591_v52 }
0x1030   :  { %v1956_v58 = vpop.f32.mrf.mxu1 }
0x1031   :  { %v1957_v59 = vadd.f32 %v2743_v51, %v1956_v58 }
0x1033   :  { %v2789_v55 = vpop.eup %2788  ;;  %v2592_v56 = vmul.f32 -1.442695, %v1957_v59 }
0x1034   :  { %v1965_v57 = vadd.f32 1.0, %v2789_v55 }
0x1035   :  { %2790 = vpow2.f32 %v2592_v56 }
0x1036   :  { %2792 = vrcp.f32 %v1965_v57  ;;  %v1978_v15 = vand.u32 2147483648, %v1965_v57  ;;  %v1976_v61 = vand.u32 2147483647, %v1965_v57  ;;  %vm1972_vm0 = vweird.f32 %v1965_v57 }
0x1038   :  { %v1979_v11 = vor.u32 1.1754944e-38, %v1978_v15  ;;  %vm1977_vm2 = vcmp.eq.f32.partialorder %v1976_v61, 8.507059e+37 }
0x103b   :  { %v2791_v0 = vpop.eup %2790 }
0x103c   :  { %v2793_v32 = vpop.eup %2792  ;;  %v1966_v34 = vadd.f32 1.0, %v2791_v0 }
0x103d   :  { %v1968_v9 = vmul.f32 %v2793_v32, %v1965_v57  ;;  %vm1973_vm15 = vweird.f32 %v2793_v32 }
0x103e   :  { %2794 = vrcp.f32 %v1966_v34  ;;  %vm1974_vm1 = vmor %vm1972_vm0, %vm1973_vm15  ;;  %v1993_v8 = vand.u32 2147483648, %v1966_v34  ;;  %v1991_v18 = vand.u32 2147483647, %v1966_v34  ;;  %vm1987_vm4 = vweird.f32 %v1966_v34 }
0x103f   :  { %v1969_v60 = vsub.f32 1.0, %v1968_v9 }
0x1040   :  { %v1994_v23 = vor.u32 1.1754944e-38, %v1993_v8  ;;  %vm1992_vm6 = vcmp.eq.f32.partialorder %v1991_v18, 8.507059e+37 }
0x1041   :  { %v1970_v10 = vmul.f32 %v2793_v32, %v1969_v60 }
0x1043   :  { %v1971_v5 = vadd.f32 %v2793_v32, %v1970_v10 }
0x1044   :  { %v2795_v62 = vpop.eup %2794 }
0x1045   :  { %v1975_v63 = vsel %vm1974_vm1, %v2793_v32, %v1971_v5  ;;  %v1983_v12 = vmul.f32 %v2795_v62, %v1966_v34  ;;  %vm1988_vm3 = vweird.f32 %v2795_v62 }
0x1046   :  { %v1980_v3 = vsel %vm1977_vm2, %v1979_v11, %v1975_v63  ;;  %vm1989_vm5 = vmor %vm1987_vm4, %vm1988_vm3 }
0x1047   :  { %1997 = vst [vmem:[%s3726_s25] sm:$0xff] %v1980_v3  ;;  %v1984_v6 = vsub.f32 1.0, %v1983_v12 }
0x1049   :  { %v1985_v14 = vmul.f32 %v2795_v62, %v1984_v6 }
0x104b   :  { %v1986_v21 = vadd.f32 %v2795_v62, %v1985_v14 }
0x104d   :  { %v1990_v13 = vsel %vm1989_vm5, %v2795_v62, %v1986_v21 }
0x104e   :  { %v1995_v1 = vsel %vm1992_vm6, %v1994_v23, %v1990_v13 }
0x104f   :  { %1998 = vst [vmem:[%s3726_s25 + $0x8] sm:$0xff] %v1995_v1 }

</bundles_post_ra>
